<compile_context>
chip_gen: v7x
topology: tpu7x:2x2x1
jax: 0.10.0
libtpu: 0.0.40
codegen_flags: <defaults>
</compile_context>

<pallas_src>
import math

import jax
import jax.numpy as jnp
from jax import lax
from jax.experimental import pallas as pl
from jax.experimental.pallas import tpu as pltpu


_LANE = 128     # lane width (last dim)
_SUBLANE = 8    # sublane width (second-to-last dim)


def _round_up(x, m):
    return ((x + m - 1) // m) * m


def _mlp_kernel(x_ref, w1_ref, b1_ref, w2_ref, b2_ref, o_ref):
    # x_ref : (TM, Dp)  VMEM  row tile of the flattened activations
    # w1_ref: (Hp, Dp)  VMEM  PyTorch layout (out_features, in_features), resident
    # b1_ref: (1,  Hp)  VMEM  resident
    # w2_ref: (Dp, Hp)  VMEM  PyTorch layout, resident
    # b2_ref: (1,  Dp)  VMEM  resident
    # o_ref : (TM, Dp)  VMEM
    x = x_ref[...]

    # First linear: contract the feature axis of x with the in_features axis of
    # w1 (PyTorch layout) -- no materialized transpose needed.
    h = lax.dot_general(
        x, w1_ref[...],
        dimension_numbers=(((1,), (1,)), ((), ())),
        preferred_element_type=jnp.float32,
    ) + b1_ref[...].astype(jnp.float32)

    # Exact (erf-based) GELU, matching torch.nn.GELU() default.
    h = 0.5 * h * (1.0 + lax.erf(h * (1.0 / math.sqrt(2.0))))

    # Second linear (PyTorch layout, contract on in_features axis).
    y = lax.dot_general(
        h.astype(w2_ref.dtype), w2_ref[...],
        dimension_numbers=(((1,), (1,)), ((), ())),
        preferred_element_type=jnp.float32,
    ) + b2_ref[...].astype(jnp.float32)

    o_ref[...] = y.astype(o_ref.dtype)


def _pad2d(a, rows, cols):
    pr, pc = rows - a.shape[0], cols - a.shape[1]
    if pr == 0 and pc == 0:
        return a
    return jnp.pad(a, ((0, pr), (0, pc)))


@jax.jit
def mlp_forward(x, w1, b1, w2, b2):
    """x: (B, S, D). w1: (H, D), b1: (H,), w2: (D, H), b2: (D,) (PyTorch layout)."""
    B, S, D = x.shape
    H = w1.shape[0]
    M = B * S

    # Lane-dense feature dims.
    Dp = _round_up(D, _LANE)
    Hp = _round_up(H, _LANE)

    # Row tile: 512 is a good default (measured ~85% of HBM roofline for f32
    # tiled kernels); shrink to a sublane multiple for tiny M.
    TM = min(512, _round_up(M, _SUBLANE))
    Mp = _round_up(M, TM)

    x2d = _pad2d(x.reshape(M, D), Mp, Dp)
    w1_p = _pad2d(w1, Hp, Dp)                 # (Hp, Dp), PyTorch layout
    w2_p = _pad2d(w2, Dp, Hp)                 # (Dp, Hp), PyTorch layout
    b1_p = _pad2d(b1.reshape(1, H), 1, Hp)    # (1, Hp)
    b2_p = _pad2d(b2.reshape(1, D), 1, Dp)    # (1, Dp)

    itm = x.dtype.itemsize
    wtm = w1.dtype.itemsize
    # VMEM budget: resident (conservatively double-buffered) weights/biases
    # + 2x-buffered x/out row tiles + the (TM, Hp) f32 intermediate + headroom.
    est = (2 * wtm * (Hp * Dp + Dp * Hp)      # weights
           + 2 * wtm * (Hp + Dp)              # biases
           + 2 * 2 * TM * Dp * itm            # x & out tiles, double-buffered
           + 4 * TM * Hp)                     # f32 intermediate
    vmem_limit = int(min(max(est + (8 << 20), 32 << 20), 100 << 20))

    grid = (Mp // TM,)

    out2d = pl.pallas_call(
        _mlp_kernel,
        out_shape=jax.ShapeDtypeStruct((Mp, Dp), x.dtype),
        grid_spec=pltpu.PrefetchScalarGridSpec(
            num_scalar_prefetch=0,
            grid=grid,
            in_specs=[
                pl.BlockSpec((TM, Dp), lambda i: (i, 0)),   # x row tile
                pl.BlockSpec((Hp, Dp), lambda i: (0, 0)),   # w1 resident
                pl.BlockSpec((1, Hp), lambda i: (0, 0)),    # b1 resident
                pl.BlockSpec((Dp, Hp), lambda i: (0, 0)),   # w2 resident
                pl.BlockSpec((1, Dp), lambda i: (0, 0)),    # b2 resident
            ],
            out_specs=pl.BlockSpec((TM, Dp), lambda i: (i, 0)),
        ),
        compiler_params=pltpu.CompilerParams(
            dimension_semantics=("parallel",),
            vmem_limit_bytes=vmem_limit,
        ),
    )(x2d, w1_p, b1_p, w2_p, b2_p)

    return out2d[:M, :D].reshape(B, S, D)


def _torch_linear_init(key, out_features, in_features, dtype=jnp.float32):
    """Deterministic init matching nn.Linear's default (uniform +/- 1/sqrt(in))."""
    kw, kb = jax.random.split(key)
    bound = 1.0 / math.sqrt(in_features)
    w = jax.random.uniform(kw, (out_features, in_features), dtype,
                           minval=-bound, maxval=bound)
    b = jax.random.uniform(kb, (out_features,), dtype,
                           minval=-bound, maxval=bound)
    return w, b


if __name__ == "__main__":
    key = jax.random.PRNGKey(0)
    k_x, k_l1, k_l2 = jax.random.split(key, 3)

    # Small shapes consistent with the module: dim=32, hidden_size=64.
    # B*S = 1024 so the row-tiled grid actually pipelines (2 steps of TM=512).
    B, S, D, H = 4, 256, 32, 64

    x = jax.random.normal(k_x, (B, S, D), jnp.float32)
    w1, b1 = _torch_linear_init(k_l1, H, D)   # Linear(dim -> hidden)
    w2, b2 = _torch_linear_init(k_l2, D, H)   # Linear(hidden -> dim)

    out = mlp_forward(x, w1, b1, w2, b2)
    out = jax.block_until_ready(out)

    # Pure-JAX reference for sanity.
    ref = jnp.einsum("bsd,hd->bsh", x, w1) + b1
    ref = jax.nn.gelu(ref, approximate=False)
    ref = jnp.einsum("bsh,dh->bsd", ref, w2) + b2

    assert out.shape == (B, S, D)
    assert jnp.allclose(out, ref, atol=1e-5, rtol=1e-5), (
        f"max err {jnp.max(jnp.abs(out - ref))}")

    print("KERNEL_OK")
</pallas_src>

<mosaic_0001>
module attributes {stable_mosaic.version = 11 : i64} {
  func.func @_mlp_kernel(%arg0: i32, %arg1: memref<512x128xf32, #tpu.memory_space<vmem>>, %arg2: memref<128x128xf32, #tpu.memory_space<vmem>>, %arg3: memref<1x128xf32, #tpu.memory_space<vmem>>, %arg4: memref<128x128xf32, #tpu.memory_space<vmem>>, %arg5: memref<1x128xf32, #tpu.memory_space<vmem>>, %arg6: memref<512x128xf32, #tpu.memory_space<vmem>>) attributes {dimension_semantics = [#tpu.dimension_semantics<parallel>], iteration_bounds = array<i64: 2>, scalar_prefetch = 0 : i64, scratch_operands = 0 : i64, tpu.core_type = #tpu.core_type<tc>, window_params = [{transform_indices = @transform_0, window_bounds = array<i64: 512, 128>}, {pipeline_mode = #tpu.pipeline_mode<synchronous>, transform_indices = @transform_1, window_bounds = array<i64: 128, 128>}, {pipeline_mode = #tpu.pipeline_mode<synchronous>, transform_indices = @transform_2, window_bounds = array<i64: 1, 128>}, {pipeline_mode = #tpu.pipeline_mode<synchronous>, transform_indices = @transform_3, window_bounds = array<i64: 128, 128>}, {pipeline_mode = #tpu.pipeline_mode<synchronous>, transform_indices = @transform_4, window_bounds = array<i64: 1, 128>}, {transform_indices = @transform_5, window_bounds = array<i64: 512, 128>}]} {
    %c0 = arith.constant 0 : index
    %c0_0 = arith.constant 0 : index
    %0 = vector.load %arg1[%c0, %c0_0] : memref<512x128xf32, #tpu.memory_space<vmem>>, vector<512x128xf32>
    %c0_1 = arith.constant 0 : index
    %c0_2 = arith.constant 0 : index
    %1 = vector.load %arg2[%c0_1, %c0_2] : memref<128x128xf32, #tpu.memory_space<vmem>>, vector<128x128xf32>
    %cst = arith.constant dense<0.000000e+00> : vector<512x128xf32>
    %2 = tpu.matmul %0, %1, %cst {dimension_numbers = #tpu.dot_dimension_numbers<[1], [1], [0], [0], [0, 0, 1, 0], [], []>} : vector<512x128xf32>, vector<128x128xf32>, vector<512x128xf32> -> vector<512x128xf32>
    %c0_3 = arith.constant 0 : index
    %c0_4 = arith.constant 0 : index
    %3 = vector.load %arg3[%c0_3, %c0_4] : memref<1x128xf32, #tpu.memory_space<vmem>>, vector<1x128xf32>
    %4 = vector.broadcast %3 : vector<1x128xf32> to vector<512x128xf32>
    %5 = arith.addf %2, %4 : vector<512x128xf32>
    %cst_5 = arith.constant 5.000000e-01 : f32
    %6 = vector.broadcast %cst_5 : f32 to vector<512x128xf32>
    %7 = arith.mulf %6, %5 : vector<512x128xf32>
    %cst_6 = arith.constant 0.707106769 : f32
    %8 = vector.broadcast %cst_6 : f32 to vector<512x128xf32>
    %9 = arith.mulf %5, %8 : vector<512x128xf32>
    %10 = math.erf %9 : vector<512x128xf32>
    %cst_7 = arith.constant 1.000000e+00 : f32
    %11 = vector.broadcast %cst_7 : f32 to vector<512x128xf32>
    %12 = arith.addf %11, %10 : vector<512x128xf32>
    %13 = arith.mulf %7, %12 : vector<512x128xf32>
    %c0_8 = arith.constant 0 : index
    %c0_9 = arith.constant 0 : index
    %14 = vector.load %arg4[%c0_8, %c0_9] : memref<128x128xf32, #tpu.memory_space<vmem>>, vector<128x128xf32>
    %cst_10 = arith.constant dense<0.000000e+00> : vector<512x128xf32>
    %15 = tpu.matmul %13, %14, %cst_10 {dimension_numbers = #tpu.dot_dimension_numbers<[1], [1], [0], [0], [0, 0, 1, 0], [], []>} : vector<512x128xf32>, vector<128x128xf32>, vector<512x128xf32> -> vector<512x128xf32>
    %c0_11 = arith.constant 0 : index
    %c0_12 = arith.constant 0 : index
    %16 = vector.load %arg5[%c0_11, %c0_12] : memref<1x128xf32, #tpu.memory_space<vmem>>, vector<1x128xf32>
    %17 = vector.broadcast %16 : vector<1x128xf32> to vector<512x128xf32>
    %18 = arith.addf %15, %17 : vector<512x128xf32>
    %c0_13 = arith.constant 0 : index
    %c0_14 = arith.constant 0 : index
    %19 = vector.load %arg6[%c0_13, %c0_14] : memref<512x128xf32, #tpu.memory_space<vmem>>, vector<512x128xf32>
    tpu.vector_store %arg6[%c0_13, %c0_14], %18 {strides = array<i32>} : memref<512x128xf32, #tpu.memory_space<vmem>>, vector<512x128xf32>,
    return
  }
  func.func @transform_0(%arg0: i32) -> (i32, i32) {
    %c0_i32 = arith.constant 0 : i32
    %c0_i32_0 = arith.constant 0 : i32
    return %arg0, %c0_i32 : i32, i32
  }
  func.func @transform_1(%arg0: i32) -> (i32, i32) {
    %c0_i32 = arith.constant 0 : i32
    %c0_i32_0 = arith.constant 0 : i32
    %c0_i32_1 = arith.constant 0 : i32
    return %c0_i32, %c0_i32_0 : i32, i32
  }
  func.func @transform_2(%arg0: i32) -> (i32, i32) {
    %c0_i32 = arith.constant 0 : i32
    %c0_i32_0 = arith.constant 0 : i32
    %c0_i32_1 = arith.constant 0 : i32
    return %c0_i32, %c0_i32_0 : i32, i32
  }
  func.func @transform_3(%arg0: i32) -> (i32, i32) {
    %c0_i32 = arith.constant 0 : i32
    %c0_i32_0 = arith.constant 0 : i32
    %c0_i32_1 = arith.constant 0 : i32
    return %c0_i32, %c0_i32_0 : i32, i32
  }
  func.func @transform_4(%arg0: i32) -> (i32, i32) {
    %c0_i32 = arith.constant 0 : i32
    %c0_i32_0 = arith.constant 0 : i32
    %c0_i32_1 = arith.constant 0 : i32
    return %c0_i32, %c0_i32_0 : i32, i32
  }
  func.func @transform_5(%arg0: i32) -> (i32, i32) {
    %c0_i32 = arith.constant 0 : i32
    %c0_i32_0 = arith.constant 0 : i32
    return %arg0, %c0_i32 : i32, i32
  }
}

</mosaic_0001>

<bundles_post_ra>
// kernel: mlp_forward.1
= control target key start
LH: loop header
LB: loop body
LE: loop exit
PB: predicated region body
PF: predicated region fallthrough
CT: control target
= control target key end

     0   :  { %s2216_s18 = smov 0   ;;  %s2815_s0 = inlined_call_operand.vmem [shape: f32[1024,128], index: 0, kind: input, shape index: {}]   ;;  %s2816_s1 = inlined_call_operand.vmem [shape: f32[128,128], index: 1, kind: input, shape index: {}]   ;;  %s2817_s2 = inlined_call_operand.vmem [shape: f32[1,128], index: 2, kind: input, shape index: {}]   ;;  %s2818_s3 = inlined_call_operand.vmem [shape: f32[128,128], index: 3, kind: input, shape index: {}]   ;;  %s2819_s4 = inlined_call_operand.vmem [shape: f32[1,128], index: 4, kind: input, shape index: {}]   ;;  %s2820_s5 = inlined_call_operand.vmem [shape: f32[1024,128], index: 5, kind: output, shape index: {}]  }
   0x1 LB: > { %s1548_s19 = sadd.s32 4294967295, %s2184_s18   ;;  %p1552_p0 = scmp.ge.s32.totalorder %s2184_s18, 1  ;;  %s2184_s18 = sphi %s2216_s18, %s15_s18  }
   0x2   : > { %p188_p1 = scmp.lt.s32.totalorder %s2184_s18, 3 }
   0x4   : > { %p189_p2 = pnand %p1552_p0, %p188_p1 }
   0x5   : > { %v292_v0 = vld [vmem:[%s2816_s1] sm:$0xff] (!%p189_p2)  ;;  %v293_v1 = vld [vmem:[%s2816_s1 + $0x8] sm:$0xff] (!%p189_p2)  ;;  %v294_v2 = vld [vmem:[%s2816_s1 + $0x10] sm:$0xff] (!%p189_p2)  ;;  %s1553_s26 = sshll.u32 (!%p189_p2), %s1548_s19, 6 }
   0x6   : > { %192 = sbr.rel (%p189_p2) target bundleno = 645 (0x285), region = 40  ;;  %v1977_v3 = vpack.c.bf16 (!%p189_p2), %v293_v1, %v292_v0  ;;  %v295_v4 = vld [vmem:[%s2816_s1 + $0x18] sm:$0xff] (!%p189_p2)  ;;  %p217_p3 = scmp.lt.s32.totalorder (!%p189_p2), %s1553_s26, 127  ;;  %v296_v6 = vld [vmem:[%s2816_s1 + $0x20] sm:$0xff] (!%p189_p2)  ;;  %v297_v7 = vld [vmem:[%s2816_s1 + $0x28] sm:$0xff] (!%p189_p2) }
   0x7   : > { %v1981_v5 = vpack.c.bf16 (!%p189_p2), %v295_v4, %v294_v2  ;;  %v1985_v9 = vpack.c.bf16 (!%p189_p2), %v297_v7, %v296_v6  ;;  %v298_v10 = vld [vmem:[%s2816_s1 + $0x30] sm:$0xff] (!%p189_p2)  ;;  %v299_v11 = vld [vmem:[%s2816_s1 + $0x38] sm:$0xff] (!%p189_p2)  ;;  %v300_v13 = vld [vmem:[%s2816_s1 + $0x40] sm:$0xff] (!%p189_p2) }
   0x8   : > { %1978 = vmatprep.subr.bf16.mxu0 (!%p189_p2), %v1977_v3  ;;  %v1989_v12 = vpack.c.bf16 (!%p189_p2), %v299_v11, %v298_v10  ;;  %v301_v14 = vld [vmem:[%s2816_s1 + $0x48] sm:$0xff] (!%p189_p2)  ;;  %v302_v16 = vld [vmem:[%s2816_s1 + $0x50] sm:$0xff] (!%p189_p2)  ;;  %v303_v17 = vld [vmem:[%s2816_s1 + $0x58] sm:$0xff] (!%p189_p2) }
   0x9   : > { %1980 = vmatpush3.bf16.xpose.msra.mxu0 (!%p189_p2), %v1977_v3  ;;  %v1993_v15 = vpack.c.bf16 (!%p189_p2), %v301_v14, %v300_v13  ;;  %v1997_v18 = vpack.c.bf16 (!%p189_p2), %v303_v17, %v302_v16  ;;  %v304_v19 = vld [vmem:[%s2816_s1 + $0x60] sm:$0xff] (!%p189_p2)  ;;  %v305_v20 = vld [vmem:[%s2816_s1 + $0x68] sm:$0xff] (!%p189_p2)  ;;  %v306_v22 = vld [vmem:[%s2816_s1 + $0x70] sm:$0xff] (!%p189_p2) }
   0xa   : > { %1982 = vmatprep.subr.bf16.mxu0 (!%p189_p2), %v1981_v5  ;;  %v2001_v21 = vpack.c.bf16 (!%p189_p2), %v305_v20, %v304_v19  ;;  %v307_v23 = vld [vmem:[%s2816_s1 + $0x78] sm:$0xff] (!%p189_p2)  ;;  %v1020_v25 = vld [vmem:[%s2818_s3] sm:$0xff] (!%p189_p2)  ;;  %v1021_v26 = vld [vmem:[%s2818_s3 + $0x8] sm:$0xff] (!%p189_p2) }
   0xb   : > { %v2005_v24 = vpack.c.bf16 (!%p189_p2), %v307_v23, %v306_v22  ;;  %v1022_v27 = vld [vmem:[%s2818_s3 + $0x10] sm:$0xff] (!%p189_p2)  ;;  %v2009_v29 = vpack.c.bf16 (!%p189_p2), %v1021_v26, %v1020_v25  ;;  %v1023_v30 = vld [vmem:[%s2818_s3 + $0x18] sm:$0xff] (!%p189_p2)  ;;  %v1024_v35 = vld [vmem:[%s2818_s3 + $0x20] sm:$0xff] (!%p189_p2) }
   0xc   : > { %v2013_v32 = vpack.c.bf16 (!%p189_p2), %v1023_v30, %v1022_v27  ;;  %v1025_v36 = vld [vmem:[%s2818_s3 + $0x28] sm:$0xff] (!%p189_p2)  ;;  %v1026_v42 = vld [vmem:[%s2818_s3 + $0x30] sm:$0xff] (!%p189_p2)  ;;  %v1027_v43 = vld [vmem:[%s2818_s3 + $0x38] sm:$0xff] (!%p189_p2) }
   0xd   : > { %s2822_s26 = smov (!%p217_p3, %s1553_s26), 127  ;;  %2010 = vmatprep.subr.bf16.mxu1 %v2009_v29  ;;  %v2017_v38 = vpack.c.bf16 %v1025_v36, %v1024_v35  ;;  %v2021_v45 = vpack.c.bf16 %v1027_v43, %v1026_v42  ;;  %v1028_v49 = vld [vmem:[%s2818_s3 + $0x40] sm:$0xff]  ;;  %v1029_v50 = vld [vmem:[%s2818_s3 + $0x48] sm:$0xff]  ;;  %v1030_v56 = vld [vmem:[%s2818_s3 + $0x50] sm:$0xff] }
   0xe   : > { %s1554_s29 = sshll.u32 %s2822_s26, 3  ;;  %2012 = vmatpush3.bf16.xpose.msra.mxu1 %v2009_v29  ;;  %v2025_v52 = vpack.c.bf16 %v1029_v50, %v1028_v49  ;;  %v1031_v57 = vld [vmem:[%s2818_s3 + $0x58] sm:$0xff]  ;;  %v1032_v25 = vld [vmem:[%s2818_s3 + $0x60] sm:$0xff]  ;;  %v1033_v26 = vld [vmem:[%s2818_s3 + $0x68] sm:$0xff] }
   0xf   : > { %s2250_s11 = scalar_lea.vmem %s2815_s0, %s1554_s29  ;;  %2014 = vmatprep.subr.bf16.mxu1 %v2013_v32  ;;  %v2029_v59 = vpack.c.bf16 %v1031_v57, %v1030_v56  ;;  %v2033_v27 = vpack.c.bf16 %v1033_v26, %v1032_v25  ;;  %s2682_s7 = scalar_lea.vmem %s2820_s5, %s1554_s29 }
  0x10   : > { %v228_v8 = vld [vmem:[%s2250_s11] sm:$0xff]  ;;  %v229_v28 = vld [vmem:[%s2250_s11 + $0x8] sm:$0xff]  ;;  %v230_v31 = vld [vmem:[%s2250_s11 + $0x10] sm:$0xff] }
  0x11   : > { %1753 = vmatprep.mubr.f32.mxu0 %v228_v8  ;;  %1984 = vmatpush3.bf16.xpose.msra.mxu0 %v1981_v5  ;;  %v231_v33 = vld [vmem:[%s2250_s11 + $0x18] sm:$0xff]  ;;  %v232_v34 = vld [vmem:[%s2250_s11 + $0x20] sm:$0xff]  ;;  %v233_v37 = vld [vmem:[%s2250_s11 + $0x28] sm:$0xff] }
  0x12   : > { %1986 = vmatprep.subr.bf16.mxu0 %v1985_v9  ;;  %v234_v39 = vld [vmem:[%s2250_s11 + $0x30] sm:$0xff]  ;;  %v235_v40 = vld [vmem:[%s2250_s11 + $0x38] sm:$0xff]  ;;  %v236_v41 = vld [vmem:[%s2250_s11 + $0x40] sm:$0xff] }
  0x13   : > { %v237_v44 = vld [vmem:[%s2250_s11 + $0x48] sm:$0xff]  ;;  %v238_v46 = vld [vmem:[%s2250_s11 + $0x50] sm:$0xff]  ;;  %v239_v47 = vld [vmem:[%s2250_s11 + $0x58] sm:$0xff] }
  0x14   : > { %v240_v48 = vld [vmem:[%s2250_s11 + $0x60] sm:$0xff]  ;;  %v241_v51 = vld [vmem:[%s2250_s11 + $0x68] sm:$0xff]  ;;  %v242_v53 = vld [vmem:[%s2250_s11 + $0x70] sm:$0xff] }
  0x15   : > { %v243_v54 = vld [vmem:[%s2250_s11 + $0x78] sm:$0xff]  ;;  %v244_v55 = vld [vmem:[%s2250_s11 + $0x80] sm:$0xff]  ;;  %v245_v58 = vld [vmem:[%s2250_s11 + $0x88] sm:$0xff] }
  0x16   : > { %2016 = vmatpush3.bf16.xpose.msra.mxu1 %v2013_v32  ;;  %v246_v60 = vld [vmem:[%s2250_s11 + $0x90] sm:$0xff]  ;;  %v247_v61 = vld [vmem:[%s2250_s11 + $0x98] sm:$0xff]  ;;  %v248_v62 = vld [vmem:[%s2250_s11 + $0xa0] sm:$0xff] }
  0x17   : > { %2018 = vmatprep.subr.bf16.mxu1 %v2017_v38  ;;  %v249_v63 = vld [vmem:[%s2250_s11 + $0xa8] sm:$0xff]  ;;  %v250_v0 = vld [vmem:[%s2250_s11 + $0xb0] sm:$0xff]  ;;  %v251_v1 = vld [vmem:[%s2250_s11 + $0xb8] sm:$0xff] }
  0x18   : > { %v252_v2 = vld [vmem:[%s2250_s11 + $0xc0] sm:$0xff]  ;;  %v253_v3 = vld [vmem:[%s2250_s11 + $0xc8] sm:$0xff]  ;;  %v254_v4 = vld [vmem:[%s2250_s11 + $0xd0] sm:$0xff] }
  0x19   : > { %1988 = vmatpush3.bf16.xpose.msra.mxu0 %v1985_v9  ;;  %v255_v5 = vld [vmem:[%s2250_s11 + $0xd8] sm:$0xff]  ;;  %v256_v6 = vld [vmem:[%s2250_s11 + $0xe0] sm:$0xff]  ;;  %v257_v7 = vld [vmem:[%s2250_s11 + $0xe8] sm:$0xff] }
  0x1a   : > { %1990 = vmatprep.subr.bf16.mxu0 %v1989_v12  ;;  %v258_v8 = vld [vmem:[%s2250_s11 + $0xf0] sm:$0xff]  ;;  %v259_v9 = vld [vmem:[%s2250_s11 + $0xf8] sm:$0xff]  ;;  %v260_v10 = vld [vmem:[%s2250_s11 + $0x100] sm:$0xff] }
  0x1b   : > { %v261_v11 = vld [vmem:[%s2250_s11 + $0x108] sm:$0xff]  ;;  %v263_v13 = vld [vmem:[%s2250_s11 + $0x118] sm:$0xff]  ;;  %v264_v14 = vld [vmem:[%s2250_s11 + $0x120] sm:$0xff] }
  0x1c   : > { %v266_v16 = vld [vmem:[%s2250_s11 + $0x130] sm:$0xff]  ;;  %v267_v17 = vld [vmem:[%s2250_s11 + $0x138] sm:$0xff]  ;;  %v269_v19 = vld [vmem:[%s2250_s11 + $0x148] sm:$0xff] }
  0x1d   : > { %v270_v20 = vld [vmem:[%s2250_s11 + $0x150] sm:$0xff]  ;;  %v272_v22 = vld [vmem:[%s2250_s11 + $0x160] sm:$0xff]  ;;  %v273_v23 = vld [vmem:[%s2250_s11 + $0x168] sm:$0xff] }
  0x1e   : > { %2020 = vmatpush3.bf16.xpose.msra.mxu1 %v2017_v38  ;;  %v276_v29 = vld [vmem:[%s2250_s11 + $0x180] sm:$0xff]  ;;  %v277_v30 = vld [vmem:[%s2250_s11 + $0x188] sm:$0xff]  ;;  %v1034_v32 = vld [vmem:[%s2818_s3 + $0x70] sm:$0xff] }
  0x1f   : > { %2022 = vmatprep.subr.bf16.mxu1 %v2021_v45  ;;  %v279_v35 = vld [vmem:[%s2250_s11 + $0x198] sm:$0xff]  ;;  %v280_v36 = vld [vmem:[%s2250_s11 + $0x1a0] sm:$0xff]  ;;  %v282_v38 = vld [vmem:[%s2250_s11 + $0x1b0] sm:$0xff] }
  0x20   : > { %v286_v42 = vld [vmem:[%s2250_s11 + $0x1d0] sm:$0xff]  ;;  %v287_v43 = vld [vmem:[%s2250_s11 + $0x1d8] sm:$0xff] }
  0x21   : > { %1992 = vmatpush3.bf16.xpose.msra.mxu0 %v1989_v12  ;;  %v262_v12 = vld [vmem:[%s2250_s11 + $0x110] sm:$0xff] }
  0x22   : > { %1994 = vmatprep.subr.bf16.mxu0 %v1993_v15 }
  0x26   : > { %2024 = vmatpush3.bf16.xpose.msra.mxu1 %v2021_v45  ;;  %v289_v45 = vld [vmem:[%s2250_s11 + $0x1e8] sm:$0xff] }
  0x27   : > { %2026 = vmatprep.subr.bf16.mxu1 %v2025_v52 }
  0x29   : > { %1996 = vmatpush3.bf16.xpose.msra.mxu0 %v1993_v15  ;;  %v265_v15 = vld [vmem:[%s2250_s11 + $0x128] sm:$0xff] }
  0x2a   : > { %1998 = vmatprep.subr.bf16.mxu0 %v1997_v18 }
  0x2e   : > { %2028 = vmatpush3.bf16.xpose.msra.mxu1 %v2025_v52 }
  0x2f   : > { %2030 = vmatprep.subr.bf16.mxu1 %v2029_v59 }
  0x31   : > { %2000 = vmatpush3.bf16.xpose.msra.mxu0 %v1997_v18  ;;  %v268_v18 = vld [vmem:[%s2250_s11 + $0x140] sm:$0xff] }
  0x32   : > { %2002 = vmatprep.subr.bf16.mxu0 %v2001_v21 }
  0x36   : > { %2032 = vmatpush3.bf16.xpose.msra.mxu1 %v2029_v59 }
  0x37   : > { %2034 = vmatprep.subr.bf16.mxu1 %v2033_v27 }
  0x39   : > { %2004 = vmatpush3.bf16.xpose.msra.mxu0 %v2001_v21  ;;  %v271_v21 = vld [vmem:[%s2250_s11 + $0x158] sm:$0xff] }
  0x3a   : > { %2006 = vmatprep.subr.bf16.mxu0 %v2005_v24 }
  0x3e   : > { %2036 = vmatpush3.bf16.xpose.msra.mxu1 %v2033_v27 }
  0x41   : > { %2008 = vmatpush3.bf16.xpose.msra.mxu0 %v2005_v24  ;;  %v274_v24 = vld [vmem:[%s2250_s11 + $0x170] sm:$0xff] }
  0x48   : > { %1754 = vmatmul.mubr.f32.vlgmr.msra.gmra.mrb[0].mxu0 %v229_v28  ;;  %v275_v28 = vld [vmem:[%s2250_s11 + $0x178] sm:$0xff] }
  0x49   : > { %1756 = vmatprep.mubr.f32.mxu0 %v230_v31  ;;  %v278_v31 = vld [vmem:[%s2250_s11 + $0x190] sm:$0xff] }
  0x4c   : > { %1757 = vmatmul.mubr.f32.gmra.mrb[2].mxu0 %v231_v33  ;;  %v1035_v33 = vld [vmem:[%s2818_s3 + $0x78] sm:$0xff] }
  0x4d   : > { %1759 = vmatprep.mubr.f32.mxu0 %v232_v34  ;;  %v2037_v34 = vpack.c.bf16 %v1035_v33, %v1034_v32 }
  0x4f   : > { %2038 = vmatprep.subr.bf16.mxu1 %v2037_v34 }
  0x50   : > { %1760 = vmatmul.mubr.f32.gmra.mrb[4].mxu0 %v233_v37  ;;  %2040 = vmatpush3.bf16.xpose.msra.mxu1 %v2037_v34  ;;  %v281_v37 = vld [vmem:[%s2250_s11 + $0x1a8] sm:$0xff] }
  0x51   : > { %1762 = vmatprep.mubr.f32.mxu0 %v234_v39  ;;  %v283_v39 = vld [vmem:[%s2250_s11 + $0x1b8] sm:$0xff] }
  0x54   : > { %1763 = vmatmul.mubr.f32.gmra.mrb[6].mxu0 %v235_v40  ;;  %v284_v40 = vld [vmem:[%s2250_s11 + $0x1c0] sm:$0xff] }
  0x55   : > { %1765 = vmatprep.mubr.f32.mxu0 %v236_v41  ;;  %v285_v41 = vld [vmem:[%s2250_s11 + $0x1c8] sm:$0xff] }
  0x58   : > { %1766 = vmatmul.mubr.f32.gmra.mrb[8].mxu0 %v237_v44  ;;  %v288_v44 = vld [vmem:[%s2250_s11 + $0x1e0] sm:$0xff] }
  0x59   : > { %1768 = vmatprep.mubr.f32.mxu0 %v238_v46  ;;  %v290_v46 = vld [vmem:[%s2250_s11 + $0x1f0] sm:$0xff] }
  0x5c   : > { %1769 = vmatmul.mubr.f32.gmra.mrb[10].mxu0 %v239_v47  ;;  %v291_v47 = vld [vmem:[%s2250_s11 + $0x1f8] sm:$0xff] }
  0x5d   : > { %1771 = vmatprep.mubr.f32.mxu0 %v240_v48  ;;  %v2397_v48 = vld [vmem:[%s2817_s2] ss:$0 sm:$0xff] }
  0x60   : > { %1772 = vmatmul.mubr.f32.gmra.mrb[12].mxu0 %v241_v51 }
  0x61   : > { %1774 = vmatprep.mubr.f32.mxu0 %v242_v53 }
  0x64   : > { %1775 = vmatmul.mubr.f32.gmra.mrb[14].mxu0 %v243_v54 }
  0x65   : > { %1777 = vmatprep.mubr.f32.mxu0 %v244_v55 }
  0x68   : > { %1778 = vmatmul.mubr.f32.gmra.mrb[16].mxu0 %v245_v58 }
  0x69   : > { %1780 = vmatprep.mubr.f32.mxu0 %v246_v60 }
  0x6c   : > { %1781 = vmatmul.mubr.f32.gmra.mrb[18].mxu0 %v247_v61 }
  0x6d   : > { %1783 = vmatprep.mubr.f32.mxu0 %v248_v62 }
  0x70   : > { %1784 = vmatmul.mubr.f32.gmra.mrb[20].mxu0 %v249_v63 }
  0x71   : > { %1786 = vmatprep.mubr.f32.mxu0 %v250_v0 }
  0x74   : > { %1787 = vmatmul.mubr.f32.gmra.mrb[22].mxu0 %v251_v1 }
  0x75   : > { %1789 = vmatprep.mubr.f32.mxu0 %v252_v2 }
  0x78   : > { %1790 = vmatmul.mubr.f32.gmra.mrb[24].mxu0 %v253_v3 }
  0x79   : > { %1792 = vmatprep.mubr.f32.mxu0 %v254_v4 }
  0x7c   : > { %1793 = vmatmul.mubr.f32.gmra.mrb[26].mxu0 %v255_v5 }
  0x7d   : > { %1795 = vmatprep.mubr.f32.mxu0 %v256_v6 }
  0x80   : > { %1796 = vmatmul.mubr.f32.gmra.mrb[28].mxu0 %v257_v7 }
  0x81   : > { %1798 = vmatprep.mubr.f32.mxu0 %v258_v8 }
  0x84   : > { %1799 = vmatmul.mubr.f32.gmra.mrb[30].mxu0 %v259_v9 }
  0x85   : > { %1801 = vmatprep.mubr.f32.mxu0 %v260_v10 }
  0x88   : > { %1802 = vmatmul.mubr.f32.gmra.mrb[32].mxu0 %v261_v11 }
  0x89   : > { %1804 = vmatprep.mubr.f32.mxu0 %v262_v12 }
  0x8c   : > { %1805 = vmatmul.mubr.f32.gmra.mrb[34].mxu0 %v263_v13 }
  0x8d   : > { %1807 = vmatprep.mubr.f32.mxu0 %v264_v14 }
  0x90   : > { %1808 = vmatmul.mubr.f32.gmra.mrb[36].mxu0 %v265_v15 }
  0x91   : > { %1810 = vmatprep.mubr.f32.mxu0 %v266_v16 }
  0x94   : > { %1811 = vmatmul.mubr.f32.gmra.mrb[38].mxu0 %v267_v17 }
  0x95   : > { %1813 = vmatprep.mubr.f32.mxu0 %v268_v18 }
  0x98   : > { %1814 = vmatmul.mubr.f32.gmra.mrb[40].mxu0 %v269_v19 }
  0x99   : > { %1816 = vmatprep.mubr.f32.mxu0 %v270_v20 }
  0x9c   : > { %1817 = vmatmul.mubr.f32.gmra.mrb[42].mxu0 %v271_v21 }
  0x9d   : > { %1819 = vmatprep.mubr.f32.mxu0 %v272_v22 }
  0xa0   : > { %1820 = vmatmul.mubr.f32.gmra.mrb[44].mxu0 %v273_v23 }
  0xa1   : > { %1822 = vmatprep.mubr.f32.mxu0 %v274_v24 }
  0xa4   : > { %1823 = vmatmul.mubr.f32.gmra.mrb[46].mxu0 %v275_v28 }
  0xa5   : > { %1825 = vmatprep.mubr.f32.mxu0 %v276_v29 }
  0xa8   : > { %1826 = vmatmul.mubr.f32.gmra.mrb[48].mxu0 %v277_v30 }
  0xa9   : > { %1828 = vmatprep.mubr.f32.mxu0 %v278_v31 }
  0xac   : > { %1829 = vmatmul.mubr.f32.gmra.mrb[50].mxu0 %v279_v35 }
  0xad   : > { %1831 = vmatprep.mubr.f32.mxu0 %v280_v36 }
  0xb0   : > { %1832 = vmatmul.mubr.f32.gmra.mrb[52].mxu0 %v281_v37 }
  0xb1   : > { %1834 = vmatprep.mubr.f32.mxu0 %v282_v38 }
  0xb4   : > { %1835 = vmatmul.mubr.f32.gmra.mrb[54].mxu0 %v283_v39 }
  0xb5   : > { %1837 = vmatprep.mubr.f32.mxu0 %v284_v40 }
  0xb8   : > { %1838 = vmatmul.mubr.f32.gmra.mrb[56].mxu0 %v285_v41 }
  0xb9   : > { %1840 = vmatprep.mubr.f32.mxu0 %v286_v42 }
  0xbc   : > { %1841 = vmatmul.mubr.f32.gmra.mrb[58].mxu0 %v287_v43 }
  0xbd   : > { %1843 = vmatprep.mubr.f32.mxu0 %v288_v44 }
  0xc0   : > { %1844 = vmatmul.mubr.f32.gmra.mrb[60].mxu0 %v289_v45 }
  0xc1   : > { %1846 = vmatprep.mubr.f32.mxu0 %v290_v46 }
  0xc4   : > { %1847 = vmatmul.mubr.f32.gmra.mrb[62].mxu0 %v291_v47 }
 0x11b   : > { %v1755_v49 = vpop.f32.mrb[0].mxu0 }
 0x11c   : > { %v387_v50 = vadd.f32 %v1755_v49, %v2397_v48  ;;  %v381_v51 = vpop.f32.mrb[1].mxu0 }
 0x11d   : > { %v382_v52 = vadd.f32 %v2397_v48, %v381_v51 }
 0x11e   : > { %v765_v53 = vmul.f32 0.70710677, %v387_v50  ;;  %v701_v17 = vmul.f32 0.5, %v387_v50 }
 0x11f   : > { %v764_v54 = vmul.f32 0.70710677, %v382_v52  ;;  %v1758_v55 = vpop.f32.mrb[2].mxu0  ;;  %v700_v15 = vmul.f32 0.5, %v382_v52 }
 0x120   : > { %2049 = verf.f32 %v765_v53  ;;  %v397_v56 = vadd.f32 %v1758_v55, %v2397_v48  ;;  %v391_v57 = vpop.f32.mrb[3].mxu0 }
 0x121   : > { %2051 = verf.f32 %v764_v54  ;;  %v392_v58 = vadd.f32 %v2397_v48, %v391_v57 }
 0x122   : > { %v767_v59 = vmul.f32 0.70710677, %v397_v56  ;;  %v703_v31 = vmul.f32 0.5, %v397_v56 }
 0x123   : > { %v766_v60 = vmul.f32 0.70710677, %v392_v58  ;;  %v1761_v61 = vpop.f32.mrb[4].mxu0  ;;  %v702_v27 = vmul.f32 0.5, %v392_v58 }
 0x124   : > { %2053 = verf.f32 %v767_v59  ;;  %v407_v62 = vadd.f32 %v1761_v61, %v2397_v48  ;;  %v401_v63 = vpop.f32.mrb[5].mxu0 }
 0x125   : > { %2055 = verf.f32 %v766_v60  ;;  %v402_v0 = vadd.f32 %v2397_v48, %v401_v63 }
 0x126   : > { %v769_v1 = vmul.f32 0.70710677, %v407_v62  ;;  %v705_v45 = vmul.f32 0.5, %v407_v62 }
 0x127   : > { %v768_v2 = vmul.f32 0.70710677, %v402_v0  ;;  %v1764_v3 = vpop.f32.mrb[6].mxu0  ;;  %v704_v41 = vmul.f32 0.5, %v402_v0 }
 0x128   : > { %2057 = verf.f32 %v769_v1  ;;  %v2406_v4 = vadd.f32 %v1764_v3, %v2397_v48  ;;  %v411_v5 = vpop.f32.mrb[7].mxu0 }
 0x129   : > { %2059 = verf.f32 %v768_v2  ;;  %v412_v6 = vadd.f32 %v2397_v48, %v411_v5 }
 0x12a   : > { %v2050_v7 = vpop.eup %2049  ;;  %v771_v8 = vmul.f32 0.70710677, %v2406_v4  ;;  %v707_v60 = vmul.f32 0.5, %v2406_v4 }
 0x12b   : > { %v2052_v9 = vpop.eup %2051  ;;  %v893_v10 = vadd.f32 1.0, %v2050_v7  ;;  %v770_v11 = vmul.f32 0.70710677, %v412_v6  ;;  %v1767_v12 = vpop.f32.mrb[8].mxu0  ;;  %v706_v56 = vmul.f32 0.5, %v412_v6 }
 0x12c   : > { %2061 = verf.f32 %v771_v8  ;;  %v2411_v13 = vadd.f32 %v1767_v12, %v2397_v48  ;;  %v421_v14 = vpop.f32.mrb[9].mxu0  ;;  %v892_v16 = vadd.f32 1.0, %v2052_v9 }
 0x12d   : > { %2063 = verf.f32 %v770_v11  ;;  %v2414_v18 = vadd.f32 %v2397_v48, %v421_v14  ;;  %v957_v26 = vmul.f32 %v893_v10, %v701_v17 }
 0x12e   : > { %v2054_v19 = vpop.eup %2053  ;;  %v773_v20 = vmul.f32 0.70710677, %v2411_v13  ;;  %v956_v21 = vmul.f32 %v892_v16, %v700_v15  ;;  %v709_v10 = vmul.f32 0.5, %v2411_v13 }
 0x12f   : > { %v2056_v22 = vpop.eup %2055  ;;  %v895_v23 = vadd.f32 1.0, %v2054_v19  ;;  %v772_v24 = vmul.f32 0.70710677, %v2414_v18  ;;  %v1770_v25 = vpop.f32.mrb[10].mxu0  ;;  %v708_v7 = vmul.f32 0.5, %v2414_v18 }
 0x130   : > { %v894_v28 = vadd.f32 1.0, %v2056_v22  ;;  %2065 = verf.f32 %v773_v20  ;;  %v2419_v29 = vadd.f32 %v1770_v25, %v2397_v48  ;;  %v431_v30 = vpop.f32.mrb[11].mxu0  ;;  %1881 = vmatprep.mubr.f32.mxu1 %v956_v21 }
 0x131   : > { %2067 = verf.f32 %v772_v24  ;;  %v2422_v32 = vadd.f32 %v2397_v48, %v431_v30  ;;  %1882 = vmatmul.mubr.f32.vlgmr.msra.gmra.mrb[0].mxu1 %v957_v26  ;;  %v959_v40 = vmul.f32 %v895_v23, %v703_v31 }
 0x132   : > { %v2058_v33 = vpop.eup %2057  ;;  %v775_v34 = vmul.f32 0.70710677, %v2419_v29  ;;  %v958_v35 = vmul.f32 %v894_v28, %v702_v27  ;;  %v711_v24 = vmul.f32 0.5, %v2419_v29 }
 0x133   : > { %v2060_v36 = vpop.eup %2059  ;;  %v897_v37 = vadd.f32 1.0, %v2058_v33  ;;  %v774_v38 = vmul.f32 0.70710677, %v2422_v32  ;;  %v1773_v39 = vpop.f32.mrb[12].mxu0  ;;  %v710_v21 = vmul.f32 0.5, %v2422_v32 }
 0x134   : > { %v896_v42 = vadd.f32 1.0, %v2060_v36  ;;  %2069 = verf.f32 %v775_v34  ;;  %v2427_v43 = vadd.f32 %v1773_v39, %v2397_v48  ;;  %v441_v44 = vpop.f32.mrb[13].mxu0  ;;  %1884 = vmatprep.mubr.f32.mxu1 %v958_v35 }
 0x135   : > { %2071 = verf.f32 %v774_v38  ;;  %v2430_v46 = vadd.f32 %v2397_v48, %v441_v44  ;;  %1885 = vmatmul.mubr.f32.gmra.mrb[2].mxu1 %v959_v40  ;;  %v961_v55 = vmul.f32 %v897_v37, %v705_v45 }
 0x136   : > { %v2062_v47 = vpop.eup %2061  ;;  %v777_v49 = vmul.f32 0.70710677, %v2427_v43  ;;  %v960_v50 = vmul.f32 %v896_v42, %v704_v41  ;;  %v713_v38 = vmul.f32 0.5, %v2427_v43 }
 0x137   : > { %v2064_v51 = vpop.eup %2063  ;;  %v899_v52 = vadd.f32 1.0, %v2062_v47  ;;  %v776_v53 = vmul.f32 0.70710677, %v2430_v46  ;;  %v1776_v54 = vpop.f32.mrb[14].mxu0  ;;  %v712_v35 = vmul.f32 0.5, %v2430_v46 }
 0x138   : > { %v898_v57 = vadd.f32 1.0, %v2064_v51  ;;  %2073 = verf.f32 %v777_v49  ;;  %v2435_v58 = vadd.f32 %v1776_v54, %v2397_v48  ;;  %v451_v59 = vpop.f32.mrb[15].mxu0  ;;  %1887 = vmatprep.mubr.f32.mxu1 %v960_v50 }
 0x139   : > { %2075 = verf.f32 %v776_v53  ;;  %v2439_v61 = vadd.f32 %v2397_v48, %v451_v59  ;;  %1888 = vmatmul.mubr.f32.gmra.mrb[4].mxu1 %v961_v55  ;;  %v963_v6 = vmul.f32 %v899_v52, %v707_v60 }
 0x13a   : > { %v2066_v62 = vpop.eup %2065  ;;  %v779_v63 = vmul.f32 0.70710677, %v2435_v58  ;;  %v962_v0 = vmul.f32 %v898_v57, %v706_v56  ;;  %v715_v53 = vmul.f32 0.5, %v2435_v58 }
 0x13b   : > { %v2068_v1 = vpop.eup %2067  ;;  %v901_v2 = vadd.f32 1.0, %v2066_v62  ;;  %v778_v3 = vmul.f32 0.70710677, %v2439_v61  ;;  %v1779_v5 = vpop.f32.mrb[16].mxu0  ;;  %v714_v50 = vmul.f32 0.5, %v2439_v61 }
 0x13c   : > { %v900_v8 = vadd.f32 1.0, %v2068_v1  ;;  %2077 = verf.f32 %v779_v63  ;;  %v2445_v4 = vadd.f32 %v1779_v5, %v2397_v48  ;;  %v461_v9 = vpop.f32.mrb[17].mxu0  ;;  %1890 = vmatprep.mubr.f32.mxu1 %v962_v0 }
 0x13d   : > { %2079 = verf.f32 %v778_v3  ;;  %v2449_v11 = vadd.f32 %v2397_v48, %v461_v9  ;;  %1891 = vmatmul.mubr.f32.gmra.mrb[6].mxu1 %v963_v6  ;;  %v965_v20 = vmul.f32 %v901_v2, %v709_v10 }
 0x13e   : > { %v2070_v12 = vpop.eup %2069  ;;  %v781_v14 = vmul.f32 0.70710677, %v2445_v4  ;;  %v964_v15 = vmul.f32 %v900_v8, %v708_v7  ;;  %v717_v3 = vmul.f32 0.5, %v2445_v4 }
 0x13f   : > { %v2072_v16 = vpop.eup %2071  ;;  %v903_v17 = vadd.f32 1.0, %v2070_v12  ;;  %v780_v18 = vmul.f32 0.70710677, %v2449_v11  ;;  %v1782_v19 = vpop.f32.mrb[18].mxu0  ;;  %v716_v0 = vmul.f32 0.5, %v2449_v11 }
 0x140   : > { %v902_v22 = vadd.f32 1.0, %v2072_v16  ;;  %2081 = verf.f32 %v781_v14  ;;  %v2455_v13 = vadd.f32 %v1782_v19, %v2397_v48  ;;  %v471_v23 = vpop.f32.mrb[19].mxu0  ;;  %1893 = vmatprep.mubr.f32.mxu1 %v964_v15 }
 0x141   : > { %2083 = verf.f32 %v780_v18  ;;  %v2459_v25 = vadd.f32 %v2397_v48, %v471_v23  ;;  %1894 = vmatmul.mubr.f32.gmra.mrb[8].mxu1 %v965_v20  ;;  %v967_v34 = vmul.f32 %v903_v17, %v711_v24 }
 0x142   : > { %v2074_v26 = vpop.eup %2073  ;;  %v783_v27 = vmul.f32 0.70710677, %v2455_v13  ;;  %v966_v28 = vmul.f32 %v902_v22, %v710_v21  ;;  %v719_v18 = vmul.f32 0.5, %v2455_v13 }
 0x143   : > { %v2076_v30 = vpop.eup %2075  ;;  %v905_v31 = vadd.f32 1.0, %v2074_v26  ;;  %v782_v32 = vmul.f32 0.70710677, %v2459_v25  ;;  %v1785_v33 = vpop.f32.mrb[20].mxu0  ;;  %v718_v15 = vmul.f32 0.5, %v2459_v25 }
 0x144   : > { %v904_v36 = vadd.f32 1.0, %v2076_v30  ;;  %2085 = verf.f32 %v783_v27  ;;  %v2465_v29 = vadd.f32 %v1785_v33, %v2397_v48  ;;  %v481_v37 = vpop.f32.mrb[21].mxu0  ;;  %1896 = vmatprep.mubr.f32.mxu1 %v966_v28 }
 0x145   : > { %2087 = verf.f32 %v782_v32  ;;  %v2469_v39 = vadd.f32 %v2397_v48, %v481_v37  ;;  %1897 = vmatmul.mubr.f32.gmra.mrb[10].mxu1 %v967_v34  ;;  %v969_v49 = vmul.f32 %v905_v31, %v713_v38 }
 0x146   : > { %v2078_v40 = vpop.eup %2077  ;;  %v785_v41 = vmul.f32 0.70710677, %v2465_v29  ;;  %v968_v42 = vmul.f32 %v904_v36, %v712_v35  ;;  %v721_v32 = vmul.f32 0.5, %v2465_v29 }
 0x147   : > { %v2080_v44 = vpop.eup %2079  ;;  %v907_v45 = vadd.f32 1.0, %v2078_v40  ;;  %v784_v46 = vmul.f32 0.70710677, %v2469_v39  ;;  %v1788_v47 = vpop.f32.mrb[22].mxu0  ;;  %v720_v28 = vmul.f32 0.5, %v2469_v39 }
 0x148   : > { %v906_v51 = vadd.f32 1.0, %v2080_v44  ;;  %2089 = verf.f32 %v785_v41  ;;  %v2475_v43 = vadd.f32 %v1788_v47, %v2397_v48  ;;  %v491_v52 = vpop.f32.mrb[23].mxu0  ;;  %1899 = vmatprep.mubr.f32.mxu1 %v968_v42 }
 0x149   : > { %2091 = verf.f32 %v784_v46  ;;  %v2479_v54 = vadd.f32 %v2397_v48, %v491_v52  ;;  %1900 = vmatmul.mubr.f32.gmra.mrb[12].mxu1 %v969_v49  ;;  %v971_v63 = vmul.f32 %v907_v45, %v715_v53 }
 0x14a   : > { %v2082_v55 = vpop.eup %2081  ;;  %v787_v56 = vmul.f32 0.70710677, %v2475_v43  ;;  %v970_v57 = vmul.f32 %v906_v51, %v714_v50  ;;  %v723_v46 = vmul.f32 0.5, %v2475_v43 }
 0x14b   : > { %v2084_v59 = vpop.eup %2083  ;;  %v909_v60 = vadd.f32 1.0, %v2082_v55  ;;  %v786_v61 = vmul.f32 0.70710677, %v2479_v54  ;;  %v1791_v62 = vpop.f32.mrb[24].mxu0  ;;  %v722_v42 = vmul.f32 0.5, %v2479_v54 }
 0x14c   : > { %v908_v1 = vadd.f32 1.0, %v2084_v59  ;;  %2093 = verf.f32 %v787_v56  ;;  %v2485_v58 = vadd.f32 %v1791_v62, %v2397_v48  ;;  %v501_v2 = vpop.f32.mrb[25].mxu0  ;;  %1902 = vmatprep.mubr.f32.mxu1 %v970_v57 }
 0x14d   : > { %2095 = verf.f32 %v786_v61  ;;  %v2489_v5 = vadd.f32 %v2397_v48, %v501_v2  ;;  %1903 = vmatmul.mubr.f32.gmra.mrb[14].mxu1 %v971_v63  ;;  %v973_v14 = vmul.f32 %v909_v60, %v717_v3 }
 0x14e   : > { %v2086_v6 = vpop.eup %2085  ;;  %v789_v7 = vmul.f32 0.70710677, %v2485_v58  ;;  %v972_v8 = vmul.f32 %v908_v1, %v716_v0  ;;  %v725_v61 = vmul.f32 0.5, %v2485_v58 }
 0x14f   : > { %v2088_v9 = vpop.eup %2087  ;;  %v911_v10 = vadd.f32 1.0, %v2086_v6  ;;  %v788_v11 = vmul.f32 0.70710677, %v2489_v5  ;;  %v1794_v12 = vpop.f32.mrb[26].mxu0  ;;  %v724_v57 = vmul.f32 0.5, %v2489_v5 }
 0x150   : > { %v910_v16 = vadd.f32 1.0, %v2088_v9  ;;  %2097 = verf.f32 %v789_v7  ;;  %v2495_v4 = vadd.f32 %v1794_v12, %v2397_v48  ;;  %v511_v17 = vpop.f32.mrb[27].mxu0  ;;  %1905 = vmatprep.mubr.f32.mxu1 %v972_v8 }
 0x151   : > { %2099 = verf.f32 %v788_v11  ;;  %v2499_v19 = vadd.f32 %v2397_v48, %v511_v17  ;;  %1906 = vmatmul.mubr.f32.gmra.mrb[16].mxu1 %v973_v14  ;;  %v975_v27 = vmul.f32 %v911_v10, %v719_v18 }
 0x152   : > { %v2090_v20 = vpop.eup %2089  ;;  %v791_v21 = vmul.f32 0.70710677, %v2495_v4  ;;  %v974_v22 = vmul.f32 %v910_v16, %v718_v15  ;;  %v727_v11 = vmul.f32 0.5, %v2495_v4 }
 0x153   : > { %v2092_v23 = vpop.eup %2091  ;;  %v913_v24 = vadd.f32 1.0, %v2090_v20  ;;  %v790_v25 = vmul.f32 0.70710677, %v2499_v19  ;;  %v1797_v26 = vpop.f32.mrb[28].mxu0  ;;  %v726_v8 = vmul.f32 0.5, %v2499_v19 }
 0x154   : > { %v912_v30 = vadd.f32 1.0, %v2092_v23  ;;  %2101 = verf.f32 %v791_v21  ;;  %v2505_v13 = vadd.f32 %v1797_v26, %v2397_v48  ;;  %v521_v31 = vpop.f32.mrb[29].mxu0  ;;  %1908 = vmatprep.mubr.f32.mxu1 %v974_v22 }
 0x155   : > { %2103 = verf.f32 %v790_v25  ;;  %v2509_v33 = vadd.f32 %v2397_v48, %v521_v31  ;;  %1909 = vmatmul.mubr.f32.gmra.mrb[18].mxu1 %v975_v27  ;;  %v977_v41 = vmul.f32 %v913_v24, %v721_v32 }
 0x156   : > { %v2094_v34 = vpop.eup %2093  ;;  %v793_v35 = vmul.f32 0.70710677, %v2505_v13  ;;  %v976_v36 = vmul.f32 %v912_v30, %v720_v28  ;;  %v729_v25 = vmul.f32 0.5, %v2505_v13 }
 0x157   : > { %v2096_v37 = vpop.eup %2095  ;;  %v915_v38 = vadd.f32 1.0, %v2094_v34  ;;  %v792_v39 = vmul.f32 0.70710677, %v2509_v33  ;;  %v1800_v40 = vpop.f32.mrb[30].mxu0  ;;  %v728_v22 = vmul.f32 0.5, %v2509_v33 }
 0x158   : > { %v914_v44 = vadd.f32 1.0, %v2096_v37  ;;  %2105 = verf.f32 %v793_v35  ;;  %v2515_v29 = vadd.f32 %v1800_v40, %v2397_v48  ;;  %v531_v45 = vpop.f32.mrb[31].mxu0  ;;  %1911 = vmatprep.mubr.f32.mxu1 %v976_v36 }
 0x159   : > { %2107 = verf.f32 %v792_v39  ;;  %v2519_v47 = vadd.f32 %v2397_v48, %v531_v45  ;;  %1912 = vmatmul.mubr.f32.gmra.mrb[20].mxu1 %v977_v41  ;;  %v979_v56 = vmul.f32 %v915_v38, %v723_v46 }
 0x15a   : > { %v2098_v49 = vpop.eup %2097  ;;  %v795_v50 = vmul.f32 0.70710677, %v2515_v29  ;;  %v978_v51 = vmul.f32 %v914_v44, %v722_v42  ;;  %v731_v39 = vmul.f32 0.5, %v2515_v29 }
 0x15b   : > { %v2100_v52 = vpop.eup %2099  ;;  %v917_v53 = vadd.f32 1.0, %v2098_v49  ;;  %v794_v54 = vmul.f32 0.70710677, %v2519_v47  ;;  %v1803_v55 = vpop.f32.mrb[32].mxu0  ;;  %v730_v36 = vmul.f32 0.5, %v2519_v47 }
 0x15c   : > { %v916_v59 = vadd.f32 1.0, %v2100_v52  ;;  %2109 = verf.f32 %v795_v50  ;;  %v2525_v43 = vadd.f32 %v1803_v55, %v2397_v48  ;;  %v541_v60 = vpop.f32.mrb[33].mxu0  ;;  %1914 = vmatprep.mubr.f32.mxu1 %v978_v51 }
 0x15d   : > { %2111 = verf.f32 %v794_v54  ;;  %v2529_v62 = vadd.f32 %v2397_v48, %v541_v60  ;;  %1915 = vmatmul.mubr.f32.gmra.mrb[22].mxu1 %v979_v56  ;;  %v981_v7 = vmul.f32 %v917_v53, %v725_v61 }
 0x15e   : > { %v2102_v63 = vpop.eup %2101  ;;  %v797_v0 = vmul.f32 0.70710677, %v2525_v43  ;;  %v980_v1 = vmul.f32 %v916_v59, %v724_v57  ;;  %v733_v54 = vmul.f32 0.5, %v2525_v43 }
 0x15f   : > { %v2104_v2 = vpop.eup %2103  ;;  %v919_v3 = vadd.f32 1.0, %v2102_v63  ;;  %v796_v5 = vmul.f32 0.70710677, %v2529_v62  ;;  %v1806_v6 = vpop.f32.mrb[34].mxu0  ;;  %v732_v51 = vmul.f32 0.5, %v2529_v62 }
 0x160   : > { %v918_v9 = vadd.f32 1.0, %v2104_v2  ;;  %2113 = verf.f32 %v797_v0  ;;  %v2535_v58 = vadd.f32 %v1806_v6, %v2397_v48  ;;  %v551_v10 = vpop.f32.mrb[35].mxu0  ;;  %1917 = vmatprep.mubr.f32.mxu1 %v980_v1 }
 0x161   : > { %2115 = verf.f32 %v796_v5  ;;  %v2539_v12 = vadd.f32 %v2397_v48, %v551_v10  ;;  %1918 = vmatmul.mubr.f32.gmra.mrb[24].mxu1 %v981_v7  ;;  %v983_v21 = vmul.f32 %v919_v3, %v727_v11 }
 0x162   : > { %v2106_v14 = vpop.eup %2105  ;;  %v799_v15 = vmul.f32 0.70710677, %v2535_v58  ;;  %v982_v16 = vmul.f32 %v918_v9, %v726_v8  ;;  %v735_v5 = vmul.f32 0.5, %v2535_v58 }
 0x163   : > { %v2108_v17 = vpop.eup %2107  ;;  %v921_v18 = vadd.f32 1.0, %v2106_v14  ;;  %v798_v19 = vmul.f32 0.70710677, %v2539_v12  ;;  %v1809_v20 = vpop.f32.mrb[36].mxu0  ;;  %v734_v1 = vmul.f32 0.5, %v2539_v12 }
 0x164   : > { %v920_v23 = vadd.f32 1.0, %v2108_v17  ;;  %2117 = verf.f32 %v799_v15  ;;  %v2545_v4 = vadd.f32 %v1809_v20, %v2397_v48  ;;  %v561_v24 = vpop.f32.mrb[37].mxu0  ;;  %1920 = vmatprep.mubr.f32.mxu1 %v982_v16 }
 0x165   : > { %2119 = verf.f32 %v798_v19  ;;  %v2549_v26 = vadd.f32 %v2397_v48, %v561_v24  ;;  %1921 = vmatmul.mubr.f32.gmra.mrb[26].mxu1 %v983_v21  ;;  %v985_v35 = vmul.f32 %v921_v18, %v729_v25 }
 0x166   : > { %v2110_v27 = vpop.eup %2109  ;;  %v801_v28 = vmul.f32 0.70710677, %v2545_v4  ;;  %v984_v30 = vmul.f32 %v920_v23, %v728_v22  ;;  %v737_v19 = vmul.f32 0.5, %v2545_v4 }
 0x167   : > { %v2112_v31 = vpop.eup %2111  ;;  %v923_v32 = vadd.f32 1.0, %v2110_v27  ;;  %v800_v33 = vmul.f32 0.70710677, %v2549_v26  ;;  %v1812_v34 = vpop.f32.mrb[38].mxu0  ;;  %v736_v16 = vmul.f32 0.5, %v2549_v26 }
 0x168   : > { %v922_v37 = vadd.f32 1.0, %v2112_v31  ;;  %2121 = verf.f32 %v801_v28  ;;  %v2555_v13 = vadd.f32 %v1812_v34, %v2397_v48  ;;  %v571_v38 = vpop.f32.mrb[39].mxu0  ;;  %1923 = vmatprep.mubr.f32.mxu1 %v984_v30 }
 0x169   : > { %2123 = verf.f32 %v800_v33  ;;  %v2559_v40 = vadd.f32 %v2397_v48, %v571_v38  ;;  %1924 = vmatmul.mubr.f32.gmra.mrb[28].mxu1 %v985_v35  ;;  %v987_v50 = vmul.f32 %v923_v32, %v731_v39 }
 0x16a   : > { %v2114_v41 = vpop.eup %2113  ;;  %v803_v42 = vmul.f32 0.70710677, %v2555_v13  ;;  %v986_v44 = vmul.f32 %v922_v37, %v730_v36  ;;  %v739_v33 = vmul.f32 0.5, %v2555_v13 }
 0x16b   : > { %v2116_v45 = vpop.eup %2115  ;;  %v925_v46 = vadd.f32 1.0, %v2114_v41  ;;  %v802_v47 = vmul.f32 0.70710677, %v2559_v40  ;;  %v1815_v49 = vpop.f32.mrb[40].mxu0  ;;  %v738_v30 = vmul.f32 0.5, %v2559_v40 }
 0x16c   : > { %v924_v52 = vadd.f32 1.0, %v2116_v45  ;;  %2125 = verf.f32 %v803_v42  ;;  %v2565_v29 = vadd.f32 %v1815_v49, %v2397_v48  ;;  %v581_v53 = vpop.f32.mrb[41].mxu0  ;;  %1926 = vmatprep.mubr.f32.mxu1 %v986_v44 }
 0x16d   : > { %2127 = verf.f32 %v802_v47  ;;  %v2569_v55 = vadd.f32 %v2397_v48, %v581_v53  ;;  %1927 = vmatmul.mubr.f32.gmra.mrb[30].mxu1 %v987_v50  ;;  %v989_v0 = vmul.f32 %v925_v46, %v733_v54 }
 0x16e   : > { %v2118_v56 = vpop.eup %2117  ;;  %v805_v57 = vmul.f32 0.70710677, %v2565_v29  ;;  %v988_v59 = vmul.f32 %v924_v52, %v732_v51  ;;  %v741_v47 = vmul.f32 0.5, %v2565_v29 }
 0x16f   : > { %v2120_v60 = vpop.eup %2119  ;;  %v927_v61 = vadd.f32 1.0, %v2118_v56  ;;  %v804_v62 = vmul.f32 0.70710677, %v2569_v55  ;;  %v1818_v63 = vpop.f32.mrb[42].mxu0  ;;  %v740_v44 = vmul.f32 0.5, %v2569_v55 }
 0x170   : > { %v926_v2 = vadd.f32 1.0, %v2120_v60  ;;  %2129 = verf.f32 %v805_v57  ;;  %v2575_v43 = vadd.f32 %v1818_v63, %v2397_v48  ;;  %v591_v3 = vpop.f32.mrb[43].mxu0  ;;  %1929 = vmatprep.mubr.f32.mxu1 %v988_v59 }
 0x171   : > { %2131 = verf.f32 %v804_v62  ;;  %v2579_v6 = vadd.f32 %v2397_v48, %v591_v3  ;;  %1930 = vmatmul.mubr.f32.gmra.mrb[32].mxu1 %v989_v0  ;;  %v991_v15 = vmul.f32 %v927_v61, %v735_v5 }
 0x172   : > { %v2122_v7 = vpop.eup %2121  ;;  %v807_v8 = vmul.f32 0.70710677, %v2575_v43  ;;  %v990_v9 = vmul.f32 %v926_v2, %v734_v1  ;;  %v743_v62 = vmul.f32 0.5, %v2575_v43 }
 0x173   : > { %v2124_v10 = vpop.eup %2123  ;;  %v929_v11 = vadd.f32 1.0, %v2122_v7  ;;  %v806_v12 = vmul.f32 0.70710677, %v2579_v6  ;;  %v1821_v14 = vpop.f32.mrb[44].mxu0  ;;  %v742_v59 = vmul.f32 0.5, %v2579_v6 }
 0x174   : > { %v928_v17 = vadd.f32 1.0, %v2124_v10  ;;  %2133 = verf.f32 %v807_v8  ;;  %v2585_v58 = vadd.f32 %v1821_v14, %v2397_v48  ;;  %v601_v18 = vpop.f32.mrb[45].mxu0  ;;  %1932 = vmatprep.mubr.f32.mxu1 %v990_v9 }
 0x175   : > { %2135 = verf.f32 %v806_v12  ;;  %v2589_v20 = vadd.f32 %v2397_v48, %v601_v18  ;;  %1933 = vmatmul.mubr.f32.gmra.mrb[34].mxu1 %v991_v15  ;;  %v993_v28 = vmul.f32 %v929_v11, %v737_v19 }
 0x176   : > { %v2126_v21 = vpop.eup %2125  ;;  %v809_v22 = vmul.f32 0.70710677, %v2585_v58  ;;  %v992_v23 = vmul.f32 %v928_v17, %v736_v16  ;;  %v745_v12 = vmul.f32 0.5, %v2585_v58 }
 0x177   : > { %v2128_v24 = vpop.eup %2127  ;;  %v931_v25 = vadd.f32 1.0, %v2126_v21  ;;  %v808_v26 = vmul.f32 0.70710677, %v2589_v20  ;;  %v1824_v27 = vpop.f32.mrb[46].mxu0  ;;  %v744_v9 = vmul.f32 0.5, %v2589_v20 }
 0x178   : > { %v930_v31 = vadd.f32 1.0, %v2128_v24  ;;  %2137 = verf.f32 %v809_v22  ;;  %v2595_v4 = vadd.f32 %v1824_v27, %v2397_v48  ;;  %v611_v32 = vpop.f32.mrb[47].mxu0  ;;  %1935 = vmatprep.mubr.f32.mxu1 %v992_v23 }
 0x179   : > { %2139 = verf.f32 %v808_v26  ;;  %v2599_v34 = vadd.f32 %v2397_v48, %v611_v32  ;;  %1936 = vmatmul.mubr.f32.gmra.mrb[36].mxu1 %v993_v28  ;;  %v995_v42 = vmul.f32 %v931_v25, %v739_v33 }
 0x17a   : > { %v2130_v35 = vpop.eup %2129  ;;  %v811_v36 = vmul.f32 0.70710677, %v2595_v4  ;;  %v994_v37 = vmul.f32 %v930_v31, %v738_v30  ;;  %v747_v26 = vmul.f32 0.5, %v2595_v4 }
 0x17b   : > { %v2132_v38 = vpop.eup %2131  ;;  %v933_v39 = vadd.f32 1.0, %v2130_v35  ;;  %v810_v40 = vmul.f32 0.70710677, %v2599_v34  ;;  %v1827_v41 = vpop.f32.mrb[48].mxu0  ;;  %v746_v23 = vmul.f32 0.5, %v2599_v34 }
 0x17c   : > { %v932_v45 = vadd.f32 1.0, %v2132_v38  ;;  %2141 = verf.f32 %v811_v36  ;;  %v2605_v13 = vadd.f32 %v1827_v41, %v2397_v48  ;;  %v621_v46 = vpop.f32.mrb[49].mxu0  ;;  %1938 = vmatprep.mubr.f32.mxu1 %v994_v37 }
 0x17d   : > { %2143 = verf.f32 %v810_v40  ;;  %v2609_v49 = vadd.f32 %v2397_v48, %v621_v46  ;;  %1939 = vmatmul.mubr.f32.gmra.mrb[38].mxu1 %v995_v42  ;;  %v997_v57 = vmul.f32 %v933_v39, %v741_v47 }
 0x17e   : > { %v2134_v50 = vpop.eup %2133  ;;  %v813_v51 = vmul.f32 0.70710677, %v2605_v13  ;;  %v996_v52 = vmul.f32 %v932_v45, %v740_v44  ;;  %v749_v40 = vmul.f32 0.5, %v2605_v13 }
 0x17f   : > { %v2136_v53 = vpop.eup %2135  ;;  %v935_v54 = vadd.f32 1.0, %v2134_v50  ;;  %v812_v55 = vmul.f32 0.70710677, %v2609_v49  ;;  %v1830_v56 = vpop.f32.mrb[50].mxu0  ;;  %v748_v37 = vmul.f32 0.5, %v2609_v49 }
 0x180   : > { %v934_v60 = vadd.f32 1.0, %v2136_v53  ;;  %2145 = verf.f32 %v813_v51  ;;  %v2615_v29 = vadd.f32 %v1830_v56, %v2397_v48  ;;  %v631_v61 = vpop.f32.mrb[51].mxu0  ;;  %1941 = vmatprep.mubr.f32.mxu1 %v996_v52 }
 0x181   : > { %2147 = verf.f32 %v812_v55  ;;  %v2619_v63 = vadd.f32 %v2397_v48, %v631_v61  ;;  %1942 = vmatmul.mubr.f32.gmra.mrb[40].mxu1 %v997_v57  ;;  %v999_v8 = vmul.f32 %v935_v54, %v743_v62 }
 0x182   : > { %v2138_v0 = vpop.eup %2137  ;;  %v815_v1 = vmul.f32 0.70710677, %v2615_v29  ;;  %v998_v2 = vmul.f32 %v934_v60, %v742_v59  ;;  %v751_v55 = vmul.f32 0.5, %v2615_v29 }
 0x183   : > { %v2140_v3 = vpop.eup %2139  ;;  %v937_v5 = vadd.f32 1.0, %v2138_v0  ;;  %v814_v6 = vmul.f32 0.70710677, %v2619_v63  ;;  %v1833_v7 = vpop.f32.mrb[52].mxu0  ;;  %v750_v52 = vmul.f32 0.5, %v2619_v63 }
 0x184   : > { %v936_v10 = vadd.f32 1.0, %v2140_v3  ;;  %2149 = verf.f32 %v815_v1  ;;  %v2625_v43 = vadd.f32 %v1833_v7, %v2397_v48  ;;  %v641_v11 = vpop.f32.mrb[53].mxu0  ;;  %1944 = vmatprep.mubr.f32.mxu1 %v998_v2 }
 0x185   : > { %2151 = verf.f32 %v814_v6  ;;  %v2629_v14 = vadd.f32 %v2397_v48, %v641_v11  ;;  %1945 = vmatmul.mubr.f32.gmra.mrb[42].mxu1 %v999_v8  ;;  %v1001_v22 = vmul.f32 %v937_v5, %v745_v12 }
 0x186   : > { %v2142_v15 = vpop.eup %2141  ;;  %v817_v16 = vmul.f32 0.70710677, %v2625_v43  ;;  %v1000_v17 = vmul.f32 %v936_v10, %v744_v9  ;;  %v753_v6 = vmul.f32 0.5, %v2625_v43  ;;  %v2177_v43 = vld [vmem:[%s2817_s2] ss:$0 sm:$0xff] }
 0x187   : > { %v2144_v18 = vpop.eup %2143  ;;  %v939_v19 = vadd.f32 1.0, %v2142_v15  ;;  %v816_v20 = vmul.f32 0.70710677, %v2629_v14  ;;  %v1836_v21 = vpop.f32.mrb[54].mxu0  ;;  %v752_v2 = vmul.f32 0.5, %v2629_v14 }
 0x188   : > { %v938_v24 = vadd.f32 1.0, %v2144_v18  ;;  %2153 = verf.f32 %v817_v16  ;;  %v2635_v58 = vadd.f32 %v1836_v21, %v2397_v48  ;;  %v651_v25 = vpop.f32.mrb[55].mxu0  ;;  %1947 = vmatprep.mubr.f32.mxu1 %v1000_v17 }
 0x189   : > { %2155 = verf.f32 %v816_v20  ;;  %v2639_v27 = vadd.f32 %v2397_v48, %v651_v25  ;;  %1948 = vmatmul.mubr.f32.gmra.mrb[44].mxu1 %v1001_v22  ;;  %v1003_v36 = vmul.f32 %v939_v19, %v747_v26 }
 0x18a   : > { %v2146_v28 = vpop.eup %2145  ;;  %v819_v30 = vmul.f32 0.70710677, %v2635_v58  ;;  %v1002_v31 = vmul.f32 %v938_v24, %v746_v23 }
 0x18b   : > { %v2148_v32 = vpop.eup %2147  ;;  %v941_v33 = vadd.f32 1.0, %v2146_v28  ;;  %v818_v34 = vmul.f32 0.70710677, %v2639_v27  ;;  %v1839_v35 = vpop.f32.mrb[56].mxu0  ;;  %v754_v17 = vmul.f32 0.5, %v2639_v27 }
 0x18c   : > { %v940_v38 = vadd.f32 1.0, %v2148_v32  ;;  %2157 = verf.f32 %v819_v30  ;;  %v2645_v4 = vadd.f32 %v1839_v35, %v2397_v48  ;;  %v661_v39 = vpop.f32.mrb[57].mxu0  ;;  %1950 = vmatprep.mubr.f32.mxu1 %v1002_v31 }
 0x18d   : > { %2159 = verf.f32 %v818_v34  ;;  %v2649_v41 = vadd.f32 %v2397_v48, %v661_v39  ;;  %1951 = vmatmul.mubr.f32.gmra.mrb[46].mxu1 %v1003_v36  ;;  %v1005_v51 = vmul.f32 %v941_v33, %v749_v40 }
 0x18e   : > { %v2150_v42 = vpop.eup %2149  ;;  %v821_v44 = vmul.f32 0.70710677, %v2645_v4  ;;  %v1004_v45 = vmul.f32 %v940_v38, %v748_v37  ;;  %v757_v32 = vmul.f32 0.5, %v2645_v4 }
 0x18f   : > { %v2152_v46 = vpop.eup %2151  ;;  %v943_v47 = vadd.f32 1.0, %v2150_v42  ;;  %v820_v49 = vmul.f32 0.70710677, %v2649_v41  ;;  %v1842_v50 = vpop.f32.mrb[58].mxu0  ;;  %v756_v30 = vmul.f32 0.5, %v2649_v41 }
 0x190   : > { %v942_v53 = vadd.f32 1.0, %v2152_v46  ;;  %2161 = verf.f32 %v821_v44  ;;  %v2655_v13 = vadd.f32 %v1842_v50, %v2397_v48  ;;  %v671_v54 = vpop.f32.mrb[59].mxu0  ;;  %1953 = vmatprep.mubr.f32.mxu1 %v1004_v45 }
 0x191   : > { %2163 = verf.f32 %v820_v49  ;;  %v672_v56 = vadd.f32 %v2397_v48, %v671_v54  ;;  %1954 = vmatmul.mubr.f32.gmra.mrb[48].mxu1 %v1005_v51  ;;  %v1007_v1 = vmul.f32 %v943_v47, %v751_v55 }
 0x192   : > { %v2154_v57 = vpop.eup %2153  ;;  %v823_v59 = vmul.f32 0.70710677, %v2655_v13  ;;  %v1006_v60 = vmul.f32 %v942_v53, %v750_v52  ;;  %v759_v39 = vmul.f32 0.5, %v2655_v13 }
 0x193   : > { %v2156_v61 = vpop.eup %2155  ;;  %v945_v62 = vadd.f32 1.0, %v2154_v57  ;;  %v822_v63 = vmul.f32 0.70710677, %v672_v56  ;;  %v1845_v0 = vpop.f32.mrb[60].mxu0  ;;  %v758_v37 = vmul.f32 0.5, %v672_v56 }
 0x194   : > { %v944_v3 = vadd.f32 1.0, %v2156_v61  ;;  %2165 = verf.f32 %v823_v59  ;;  %v687_v5 = vadd.f32 %v1845_v0, %v2397_v48  ;;  %v681_v29 = vpop.f32.mrb[61].mxu0  ;;  %1956 = vmatprep.mubr.f32.mxu1 %v1006_v60  ;;  %v2675_v59 = vld [vmem:[%s2819_s4] ss:$0 sm:$0xff] }
 0x195   : > { %2167 = verf.f32 %v822_v63  ;;  %v682_v7 = vadd.f32 %v2397_v48, %v681_v29  ;;  %1957 = vmatmul.mubr.f32.gmra.mrb[50].mxu1 %v1007_v1  ;;  %v1009_v14 = vmul.f32 %v945_v62, %v753_v6  ;;  %v755_v48 = vmul.f32 0.5, %v2635_v58 }
 0x196   : > { %v2158_v8 = vpop.eup %2157  ;;  %v825_v9 = vmul.f32 0.70710677, %v687_v5  ;;  %v1008_v10 = vmul.f32 %v944_v3, %v752_v2  ;;  %v761_v47 = vmul.f32 0.5, %v687_v5 }
 0x197   : > { %v2160_v11 = vpop.eup %2159  ;;  %v947_v12 = vadd.f32 1.0, %v2158_v8  ;;  %v824_v15 = vmul.f32 0.70710677, %v682_v7  ;;  %v1848_v16 = vpop.f32.mrb[62].mxu0  ;;  %v760_v46 = vmul.f32 0.5, %v682_v7 }
 0x198   : > { %v946_v18 = vadd.f32 1.0, %v2160_v11  ;;  %2169 = verf.f32 %v825_v9  ;;  %v697_v19 = vadd.f32 %v2177_v43, %v1848_v16  ;;  %v691_v20 = vpop.f32.mrb[63].mxu0  ;;  %1959 = vmatprep.mubr.f32.mxu1 %v1008_v10 }
 0x199   : > { %2171 = verf.f32 %v824_v15  ;;  %v692_v21 = vadd.f32 %v2177_v43, %v691_v20  ;;  %1960 = vmatmul.mubr.f32.gmra.mrb[52].mxu1 %v1009_v14  ;;  %v1011_v28 = vmul.f32 %v947_v12, %v755_v48 }
 0x19a   : > { %v2162_v22 = vpop.eup %2161  ;;  %v827_v23 = vmul.f32 0.70710677, %v697_v19  ;;  %v1010_v24 = vmul.f32 %v946_v18, %v754_v17  ;;  %v763_v13 = vmul.f32 0.5, %v697_v19 }
 0x19b   : > { %v2164_v25 = vpop.eup %2163  ;;  %v949_v26 = vadd.f32 1.0, %v2162_v22  ;;  %v826_v27 = vmul.f32 0.70710677, %v692_v21  ;;  %v762_v54 = vmul.f32 0.5, %v692_v21 }
 0x19c   : > { %v948_v31 = vadd.f32 1.0, %v2164_v25  ;;  %2173 = verf.f32 %v827_v23  ;;  %1962 = vmatprep.mubr.f32.mxu1 %v1010_v24 }
 0x19d   : > { %2175 = verf.f32 %v826_v27  ;;  %1963 = vmatmul.mubr.f32.gmra.mrb[54].mxu1 %v1011_v28  ;;  %v1013_v36 = vmul.f32 %v949_v26, %v757_v32 }
 0x19e   : > { %v2166_v58 = vpop.eup %2165  ;;  %v1012_v33 = vmul.f32 %v948_v31, %v756_v30 }
 0x19f   : > { %v2168_v34 = vpop.eup %2167  ;;  %v951_v35 = vadd.f32 1.0, %v2166_v58 }
 0x1a0   : > { %v950_v38 = vadd.f32 1.0, %v2168_v34  ;;  %1965 = vmatprep.mubr.f32.mxu1 %v1012_v33 }
 0x1a1   : > { %1966 = vmatmul.mubr.f32.gmra.mrb[56].mxu1 %v1013_v36  ;;  %v1015_v45 = vmul.f32 %v951_v35, %v759_v39 }
 0x1a2   : > { %v2170_v40 = vpop.eup %2169  ;;  %v1014_v41 = vmul.f32 %v950_v38, %v758_v37 }
 0x1a3   : > { %v2172_v42 = vpop.eup %2171  ;;  %v953_v44 = vadd.f32 1.0, %v2170_v40 }
 0x1a4   : > { %v952_v4 = vadd.f32 1.0, %v2172_v42  ;;  %1968 = vmatprep.mubr.f32.mxu1 %v1014_v41 }
 0x1a5   : > { %1969 = vmatmul.mubr.f32.gmra.mrb[58].mxu1 %v1015_v45  ;;  %v1017_v53 = vmul.f32 %v953_v44, %v761_v47 }
 0x1a6   : > { %v2174_v49 = vpop.eup %2173  ;;  %v1016_v50 = vmul.f32 %v952_v4, %v760_v46 }
 0x1a7   : > { %v2176_v51 = vpop.eup %2175  ;;  %v955_v52 = vadd.f32 1.0, %v2174_v49 }
 0x1a8   : > { %v954_v55 = vadd.f32 1.0, %v2176_v51  ;;  %1971 = vmatprep.mubr.f32.mxu1 %v1016_v50 }
 0x1a9   : > { %1972 = vmatmul.mubr.f32.gmra.mrb[60].mxu1 %v1017_v53  ;;  %v1019_v57 = vmul.f32 %v955_v52, %v763_v13 }
 0x1aa   : > { %v1018_v56 = vmul.f32 %v954_v55, %v762_v54 }
 0x1ac   : > { %1974 = vmatprep.mubr.f32.mxu1 %v1018_v56 }
 0x1ad   : > { %1975 = vmatmul.mubr.f32.gmra.mrb[62].mxu1 %v1019_v57 }
 0x204   : > { %v1883_v60 = vpop.f32.mrb[0].mxu1 }
 0x205   : > { %v1115_v61 = vadd.f32 %v1883_v60, %v2675_v59  ;;  %v1109_v62 = vpop.f32.mrb[1].mxu1 }
 0x206   : > { %v1110_v63 = vadd.f32 %v2675_v59, %v1109_v62 }
 0x207   : > { %1429 = vst [vmem:[%s2682_s7 + $0x8] sm:$0xff] %v1115_v61 }
 0x208   : > { %1428 = vst [vmem:[%s2682_s7] sm:$0xff] %v1110_v63  ;;  %v1886_v0 = vpop.f32.mrb[2].mxu1 }
 0x209   : > { %v1125_v1 = vadd.f32 %v1886_v0, %v2675_v59  ;;  %v1119_v2 = vpop.f32.mrb[3].mxu1 }
 0x20a   : > { %v1120_v3 = vadd.f32 %v2675_v59, %v1119_v2 }
 0x20b   : > { %1431 = vst [vmem:[%s2682_s7 + $0x18] sm:$0xff] %v1125_v1 }
 0x20c   : > { %1430 = vst [vmem:[%s2682_s7 + $0x10] sm:$0xff] %v1120_v3  ;;  %v1889_v5 = vpop.f32.mrb[4].mxu1 }
 0x20d   : > { %v1135_v29 = vadd.f32 %v1889_v5, %v2675_v59  ;;  %v1129_v6 = vpop.f32.mrb[5].mxu1 }
 0x20e   : > { %v1130_v7 = vadd.f32 %v2675_v59, %v1129_v6 }
 0x20f   : > { %1433 = vst [vmem:[%s2682_s7 + $0x28] sm:$0xff] %v1135_v29 }
 0x210   : > { %1432 = vst [vmem:[%s2682_s7 + $0x20] sm:$0xff] %v1130_v7  ;;  %v1892_v8 = vpop.f32.mrb[6].mxu1 }
 0x211   : > { %v1145_v9 = vadd.f32 %v1892_v8, %v2675_v59  ;;  %v1139_v10 = vpop.f32.mrb[7].mxu1 }
 0x212   : > { %v1140_v11 = vadd.f32 %v2675_v59, %v1139_v10 }
 0x213   : > { %1435 = vst [vmem:[%s2682_s7 + $0x38] sm:$0xff] %v1145_v9 }
 0x214   : > { %1434 = vst [vmem:[%s2682_s7 + $0x30] sm:$0xff] %v1140_v11  ;;  %v1895_v12 = vpop.f32.mrb[8].mxu1 }
 0x215   : > { %v1155_v15 = vadd.f32 %v1895_v12, %v2675_v59  ;;  %v1149_v16 = vpop.f32.mrb[9].mxu1 }
 0x216   : > { %v1150_v14 = vadd.f32 %v2675_v59, %v1149_v16 }
 0x217   : > { %1437 = vst [vmem:[%s2682_s7 + $0x48] sm:$0xff] %v1155_v15 }
 0x218   : > { %1436 = vst [vmem:[%s2682_s7 + $0x40] sm:$0xff] %v1150_v14  ;;  %v1898_v17 = vpop.f32.mrb[10].mxu1 }
 0x219   : > { %v1165_v18 = vadd.f32 %v1898_v17, %v2675_v59  ;;  %v1159_v43 = vpop.f32.mrb[11].mxu1 }
 0x21a   : > { %v1160_v19 = vadd.f32 %v2675_v59, %v1159_v43 }
 0x21b   : > { %1439 = vst [vmem:[%s2682_s7 + $0x58] sm:$0xff] %v1165_v18 }
 0x21c   : > { %1438 = vst [vmem:[%s2682_s7 + $0x50] sm:$0xff] %v1160_v19  ;;  %v1901_v20 = vpop.f32.mrb[12].mxu1 }
 0x21d   : > { %v1175_v48 = vadd.f32 %v1901_v20, %v2675_v59  ;;  %v1169_v21 = vpop.f32.mrb[13].mxu1 }
 0x21e   : > { %v1170_v22 = vadd.f32 %v2675_v59, %v1169_v21 }
 0x21f   : > { %1441 = vst [vmem:[%s2682_s7 + $0x68] sm:$0xff] %v1175_v48 }
 0x220   : > { %1440 = vst [vmem:[%s2682_s7 + $0x60] sm:$0xff] %v1170_v22  ;;  %v1904_v23 = vpop.f32.mrb[14].mxu1 }
 0x221   : > { %v1185_v24 = vadd.f32 %v1904_v23, %v2675_v59  ;;  %v1179_v25 = vpop.f32.mrb[15].mxu1 }
 0x222   : > { %v1180_v26 = vadd.f32 %v2675_v59, %v1179_v25 }
 0x223   : > { %1443 = vst [vmem:[%s2682_s7 + $0x78] sm:$0xff] %v1185_v24 }
 0x224   : > { %1442 = vst [vmem:[%s2682_s7 + $0x70] sm:$0xff] %v1180_v26  ;;  %v1907_v27 = vpop.f32.mrb[16].mxu1 }
 0x225   : > { %v1195_v28 = vadd.f32 %v1907_v27, %v2675_v59  ;;  %v1189_v30 = vpop.f32.mrb[17].mxu1 }
 0x226   : > { %v1190_v31 = vadd.f32 %v2675_v59, %v1189_v30 }
 0x227   : > { %1445 = vst [vmem:[%s2682_s7 + $0x88] sm:$0xff] %v1195_v28 }
 0x228   : > { %1444 = vst [vmem:[%s2682_s7 + $0x80] sm:$0xff] %v1190_v31  ;;  %v1910_v32 = vpop.f32.mrb[18].mxu1 }
 0x229   : > { %v1205_v58 = vadd.f32 %v1910_v32, %v2675_v59  ;;  %v1199_v33 = vpop.f32.mrb[19].mxu1 }
 0x22a   : > { %v1200_v34 = vadd.f32 %v2675_v59, %v1199_v33 }
 0x22b   : > { %1447 = vst [vmem:[%s2682_s7 + $0x98] sm:$0xff] %v1205_v58 }
 0x22c   : > { %1446 = vst [vmem:[%s2682_s7 + $0x90] sm:$0xff] %v1200_v34  ;;  %v1913_v35 = vpop.f32.mrb[20].mxu1 }
 0x22d   : > { %v1215_v36 = vadd.f32 %v1913_v35, %v2675_v59  ;;  %v1209_v37 = vpop.f32.mrb[21].mxu1 }
 0x22e   : > { %v1210_v38 = vadd.f32 %v2675_v59, %v1209_v37 }
 0x22f   : > { %1449 = vst [vmem:[%s2682_s7 + $0xa8] sm:$0xff] %v1215_v36 }
 0x230   : > { %1448 = vst [vmem:[%s2682_s7 + $0xa0] sm:$0xff] %v1210_v38  ;;  %v1916_v39 = vpop.f32.mrb[22].mxu1 }
 0x231   : > { %v1225_v40 = vadd.f32 %v1916_v39, %v2675_v59  ;;  %v1219_v41 = vpop.f32.mrb[23].mxu1 }
 0x232   : > { %v1220_v42 = vadd.f32 %v2675_v59, %v1219_v41 }
 0x233   : > { %1451 = vst [vmem:[%s2682_s7 + $0xb8] sm:$0xff] %v1225_v40 }
 0x234   : > { %1450 = vst [vmem:[%s2682_s7 + $0xb0] sm:$0xff] %v1220_v42  ;;  %v1919_v44 = vpop.f32.mrb[24].mxu1 }
 0x235   : > { %v1235_v45 = vadd.f32 %v1919_v44, %v2675_v59  ;;  %v1229_v46 = vpop.f32.mrb[25].mxu1 }
 0x236   : > { %v1230_v4 = vadd.f32 %v2675_v59, %v1229_v46 }
 0x237   : > { %1453 = vst [vmem:[%s2682_s7 + $0xc8] sm:$0xff] %v1235_v45 }
 0x238   : > { %1452 = vst [vmem:[%s2682_s7 + $0xc0] sm:$0xff] %v1230_v4  ;;  %v1922_v47 = vpop.f32.mrb[26].mxu1 }
 0x239   : > { %v1245_v49 = vadd.f32 %v1922_v47, %v2675_v59  ;;  %v1239_v50 = vpop.f32.mrb[27].mxu1 }
 0x23a   : > { %v1240_v51 = vadd.f32 %v2675_v59, %v1239_v50 }
 0x23b   : > { %1455 = vst [vmem:[%s2682_s7 + $0xd8] sm:$0xff] %v1245_v49 }
 0x23c   : > { %1454 = vst [vmem:[%s2682_s7 + $0xd0] sm:$0xff] %v1240_v51  ;;  %v1925_v52 = vpop.f32.mrb[28].mxu1 }
 0x23d   : > { %v1255_v53 = vadd.f32 %v1925_v52, %v2675_v59  ;;  %v1249_v54 = vpop.f32.mrb[29].mxu1 }
 0x23e   : > { %v1250_v55 = vadd.f32 %v2675_v59, %v1249_v54 }
 0x23f   : > { %1457 = vst [vmem:[%s2682_s7 + $0xe8] sm:$0xff] %v1255_v53 }
 0x240   : > { %1456 = vst [vmem:[%s2682_s7 + $0xe0] sm:$0xff] %v1250_v55  ;;  %v1928_v13 = vpop.f32.mrb[30].mxu1 }
 0x241   : > { %v1265_v56 = vadd.f32 %v1928_v13, %v2675_v59  ;;  %v1259_v57 = vpop.f32.mrb[31].mxu1 }
 0x242   : > { %v1260_v60 = vadd.f32 %v2675_v59, %v1259_v57 }
 0x243   : > { %1459 = vst [vmem:[%s2682_s7 + $0xf8] sm:$0xff] %v1265_v56 }
 0x244   : > { %1458 = vst [vmem:[%s2682_s7 + $0xf0] sm:$0xff] %v1260_v60  ;;  %v1931_v61 = vpop.f32.mrb[32].mxu1 }
 0x245   : > { %v1275_v62 = vadd.f32 %v1931_v61, %v2675_v59  ;;  %v1269_v63 = vpop.f32.mrb[33].mxu1 }
 0x246   : > { %v1270_v0 = vadd.f32 %v2675_v59, %v1269_v63 }
 0x247   : > { %1461 = vst [vmem:[%s2682_s7 + $0x108] sm:$0xff] %v1275_v62 }
 0x248   : > { %1460 = vst [vmem:[%s2682_s7 + $0x100] sm:$0xff] %v1270_v0  ;;  %v1934_v1 = vpop.f32.mrb[34].mxu1 }
 0x249   : > { %v1285_v2 = vadd.f32 %v1934_v1, %v2675_v59  ;;  %v1279_v3 = vpop.f32.mrb[35].mxu1 }
 0x24a   : > { %v1280_v5 = vadd.f32 %v2675_v59, %v1279_v3 }
 0x24b   : > { %1463 = vst [vmem:[%s2682_s7 + $0x118] sm:$0xff] %v1285_v2 }
 0x24c   : > { %1462 = vst [vmem:[%s2682_s7 + $0x110] sm:$0xff] %v1280_v5  ;;  %v1937_v29 = vpop.f32.mrb[36].mxu1 }
 0x24d   : > { %v1295_v6 = vadd.f32 %v1937_v29, %v2675_v59  ;;  %v1289_v7 = vpop.f32.mrb[37].mxu1 }
 0x24e   : > { %v1290_v8 = vadd.f32 %v2675_v59, %v1289_v7 }
 0x24f   : > { %1465 = vst [vmem:[%s2682_s7 + $0x128] sm:$0xff] %v1295_v6 }
 0x250   : > { %1464 = vst [vmem:[%s2682_s7 + $0x120] sm:$0xff] %v1290_v8  ;;  %v1940_v9 = vpop.f32.mrb[38].mxu1 }
 0x251   : > { %v1305_v10 = vadd.f32 %v1940_v9, %v2675_v59  ;;  %v1299_v11 = vpop.f32.mrb[39].mxu1 }
 0x252   : > { %v1300_v12 = vadd.f32 %v2675_v59, %v1299_v11 }
 0x253   : > { %1467 = vst [vmem:[%s2682_s7 + $0x138] sm:$0xff] %v1305_v10 }
 0x254   : > { %1466 = vst [vmem:[%s2682_s7 + $0x130] sm:$0xff] %v1300_v12  ;;  %v1943_v15 = vpop.f32.mrb[40].mxu1 }
 0x255   : > { %v1315_v16 = vadd.f32 %v1943_v15, %v2675_v59  ;;  %v1309_v14 = vpop.f32.mrb[41].mxu1 }
 0x256   : > { %v1310_v17 = vadd.f32 %v2675_v59, %v1309_v14 }
 0x257   : > { %1469 = vst [vmem:[%s2682_s7 + $0x148] sm:$0xff] %v1315_v16 }
 0x258   : > { %1468 = vst [vmem:[%s2682_s7 + $0x140] sm:$0xff] %v1310_v17  ;;  %v1946_v18 = vpop.f32.mrb[42].mxu1 }
 0x259   : > { %v1325_v43 = vadd.f32 %v1946_v18, %v2675_v59  ;;  %v1319_v19 = vpop.f32.mrb[43].mxu1 }
 0x25a   : > { %v1320_v20 = vadd.f32 %v2675_v59, %v1319_v19 }
 0x25b   : > { %1471 = vst [vmem:[%s2682_s7 + $0x158] sm:$0xff] %v1325_v43 }
 0x25c   : > { %1470 = vst [vmem:[%s2682_s7 + $0x150] sm:$0xff] %v1320_v20  ;;  %v1949_v48 = vpop.f32.mrb[44].mxu1 }
 0x25d   : > { %v1335_v21 = vadd.f32 %v1949_v48, %v2675_v59  ;;  %v1329_v22 = vpop.f32.mrb[45].mxu1 }
 0x25e   : > { %v1330_v23 = vadd.f32 %v2675_v59, %v1329_v22 }
 0x25f   : > { %1473 = vst [vmem:[%s2682_s7 + $0x168] sm:$0xff] %v1335_v21 }
 0x260   : > { %1472 = vst [vmem:[%s2682_s7 + $0x160] sm:$0xff] %v1330_v23  ;;  %v1952_v24 = vpop.f32.mrb[46].mxu1 }
 0x261   : > { %v1345_v25 = vadd.f32 %v1952_v24, %v2675_v59  ;;  %v1339_v26 = vpop.f32.mrb[47].mxu1 }
 0x262   : > { %v1340_v27 = vadd.f32 %v2675_v59, %v1339_v26 }
 0x263   : > { %1475 = vst [vmem:[%s2682_s7 + $0x178] sm:$0xff] %v1345_v25 }
 0x264   : > { %1474 = vst [vmem:[%s2682_s7 + $0x170] sm:$0xff] %v1340_v27  ;;  %v1955_v28 = vpop.f32.mrb[48].mxu1 }
 0x265   : > { %v1355_v30 = vadd.f32 %v1955_v28, %v2675_v59  ;;  %v1349_v31 = vpop.f32.mrb[49].mxu1 }
 0x266   : > { %v1350_v32 = vadd.f32 %v2675_v59, %v1349_v31 }
 0x267   : > { %1477 = vst [vmem:[%s2682_s7 + $0x188] sm:$0xff] %v1355_v30 }
 0x268   : > { %1476 = vst [vmem:[%s2682_s7 + $0x180] sm:$0xff] %v1350_v32  ;;  %v1958_v58 = vpop.f32.mrb[50].mxu1 }
 0x269   : > { %v1365_v33 = vadd.f32 %v1958_v58, %v2675_v59  ;;  %v1359_v34 = vpop.f32.mrb[51].mxu1 }
 0x26a   : > { %v1360_v35 = vadd.f32 %v2675_v59, %v1359_v34 }
 0x26b   : > { %1479 = vst [vmem:[%s2682_s7 + $0x198] sm:$0xff] %v1365_v33 }
 0x26c   : > { %1478 = vst [vmem:[%s2682_s7 + $0x190] sm:$0xff] %v1360_v35  ;;  %v1961_v36 = vpop.f32.mrb[52].mxu1 }
 0x26d   : > { %v1375_v37 = vadd.f32 %v1961_v36, %v2675_v59  ;;  %v1369_v38 = vpop.f32.mrb[53].mxu1 }
 0x26e   : > { %v1370_v39 = vadd.f32 %v2675_v59, %v1369_v38 }
 0x26f   : > { %1481 = vst [vmem:[%s2682_s7 + $0x1a8] sm:$0xff] %v1375_v37 }
 0x270   : > { %1480 = vst [vmem:[%s2682_s7 + $0x1a0] sm:$0xff] %v1370_v39  ;;  %v1964_v40 = vpop.f32.mrb[54].mxu1 }
 0x271   : > { %v1385_v41 = vadd.f32 %v1964_v40, %v2675_v59  ;;  %v1379_v42 = vpop.f32.mrb[55].mxu1 }
 0x272   : > { %v1380_v44 = vadd.f32 %v2675_v59, %v1379_v42 }
 0x273   : > { %1483 = vst [vmem:[%s2682_s7 + $0x1b8] sm:$0xff] %v1385_v41 }
 0x274   : > { %1482 = vst [vmem:[%s2682_s7 + $0x1b0] sm:$0xff] %v1380_v44  ;;  %v1967_v45 = vpop.f32.mrb[56].mxu1 }
 0x275   : > { %v1395_v46 = vadd.f32 %v1967_v45, %v2675_v59  ;;  %v1389_v4 = vpop.f32.mrb[57].mxu1 }
 0x276   : > { %v1390_v47 = vadd.f32 %v2675_v59, %v1389_v4 }
 0x277   : > { %1485 = vst [vmem:[%s2682_s7 + $0x1c8] sm:$0xff] %v1395_v46 }
 0x278   : > { %1484 = vst [vmem:[%s2682_s7 + $0x1c0] sm:$0xff] %v1390_v47  ;;  %v1970_v49 = vpop.f32.mrb[58].mxu1 }
 0x279   : > { %v1405_v50 = vadd.f32 %v1970_v49, %v2675_v59  ;;  %v1399_v51 = vpop.f32.mrb[59].mxu1 }
 0x27a   : > { %v1400_v52 = vadd.f32 %v2675_v59, %v1399_v51 }
 0x27b   : > { %1487 = vst [vmem:[%s2682_s7 + $0x1d8] sm:$0xff] %v1405_v50 }
 0x27c   : > { %1486 = vst [vmem:[%s2682_s7 + $0x1d0] sm:$0xff] %v1400_v52  ;;  %v1973_v53 = vpop.f32.mrb[60].mxu1 }
 0x27d   : > { %v1415_v54 = vadd.f32 %v1973_v53, %v2675_v59  ;;  %v1409_v55 = vpop.f32.mrb[61].mxu1 }
 0x27e   : > { %v1410_v13 = vadd.f32 %v2675_v59, %v1409_v55 }
 0x27f   : > { %1489 = vst [vmem:[%s2682_s7 + $0x1e8] sm:$0xff] %v1415_v54 }
 0x280   : > { %1488 = vst [vmem:[%s2682_s7 + $0x1e0] sm:$0xff] %v1410_v13  ;;  %v1976_v56 = vpop.f32.mrb[62].mxu1 }
 0x281   : > { %v1425_v57 = vadd.f32 %v1976_v56, %v2675_v59  ;;  %v1419_v60 = vpop.f32.mrb[63].mxu1 }
 0x282   : > { %v1420_v61 = vadd.f32 %v2675_v59, %v1419_v60 }
 0x283   : > { %1491 = vst [vmem:[%s2682_s7 + $0x1f8] sm:$0xff] %v1425_v57 }
 0x284   : > { %1490 = vst [vmem:[%s2682_s7 + $0x1f0] sm:$0xff] %v1420_v61 }
 0x285 PF: > { %s15_s18 = sadd.s32 1, %s2184_s18  }
 0x286   : > { %p12_p4 = scmp.ge.s32.totalorder %s15_s18, 4  }
 0x288   :  { %14 = sbr.rel (!%p12_p4) target bundleno = 1 (0x1), region = 70 }

</bundles_post_ra>
